<compile_context>
chip_gen: v5e
topology: v5e:2x2
jax: 0.10.0
libtpu: 0.0.40
codegen_flags: <defaults>
</compile_context>

<pallas_src>
import functools

import jax
import jax.numpy as jnp
from jax.experimental import pallas as pl
from jax.experimental.pallas import tpu as pltpu


def mlp_kernel(x_ref, w1_ref, b1_ref, w2_ref, b2_ref, o_ref):
    # In-kernel bf16 cast of the f32 input tile (VPU, hidden under DMA slack).
    x_bf = x_ref[...].astype(jnp.bfloat16)
    # lin1: (TB, D)bf16 @ (D, Hp)bf16 -> f32 acc, + bias, ReLU  (fused on VPU)
    h = jnp.dot(x_bf, w1_ref[...], preferred_element_type=jnp.float32)
    h = jnp.maximum(h + b1_ref[...], 0.0)
    # lin2: (TB, Hp)bf16 @ (Hp, Cp)bf16 -> f32 acc, + bias
    o = jnp.dot(h.astype(jnp.bfloat16), w2_ref[...],
                preferred_element_type=jnp.float32)
    o_ref[...] = (o + b2_ref[...]).astype(o_ref.dtype)


def _pad_to(a, shape, dtype):
    pads = [(0, s - d) for s, d in zip(shape, a.shape)]
    return jnp.pad(a.astype(dtype), pads)


def prepare_params(w1_t, b1, w2_t, b2):
    """One-time (model-load) pad + cast of the weights. NOT in the per-call path.

    w1_t: (num_inputs, H), b1: (H,), w2_t: (H, C), b2: (C,) — all f32.
    Returns padded bf16 weights / f32 biases with lane-friendly H, C.
    """
    D, H = w1_t.shape
    C = w2_t.shape[1]
    Hp = pl.cdiv(H, 128) * 128          # 524 -> 640
    Cp = pl.cdiv(C, 128) * 128          # 10  -> 128
    params = {
        "w1_p": _pad_to(w1_t, (D, Hp), jnp.bfloat16),
        "b1_p": _pad_to(b1.reshape(1, H), (1, Hp), jnp.float32),
        "w2_p": _pad_to(w2_t, (Hp, Cp), jnp.bfloat16),
        "b2_p": _pad_to(b2.reshape(1, C), (1, Cp), jnp.float32),
    }
    return jax.block_until_ready(params)


def linear_digit_recognizer(x, params, *, num_classes, batch_tile=256):
    """x: (B, num_inputs) f32; params from prepare_params(). Returns (B, num_classes) f32.

    batch_tile: 256 fills the MXU M-dim on v6e/v7x; prefer 128 on v5e.
    """
    B, D = x.shape
    w1_p, b1_p = params["w1_p"], params["b1_p"]
    w2_p, b2_p = params["w2_p"], params["b2_p"]
    Hp = w1_p.shape[1]
    Cp = w2_p.shape[1]

    # Batch tile: multiple of 16 (bf16 sublane packing), >= 8, capped by batch_tile.
    TB = min(batch_tile, B)
    TB = (TB // 16) * 16 if TB >= 16 else 8
    Bp = pl.cdiv(B, TB) * TB
    num_tiles = Bp // TB

    # x stays f32; pad batch rows only (zero rows are sliced away afterwards).
    x_p = _pad_to(x, (Bp, D), jnp.float32)

    # Megacore: only shard the batch axis across cores when the per-batch
    # traffic dominates the (duplicated-per-core) resident weights; otherwise
    # keep one core so the ~1.2 MB weight DMA is issued once (v7x).
    weight_bytes = w1_p.size * 2 + w2_p.size * 2
    batch_bytes = Bp * D * 4
    semantics = ("parallel",) if (num_tiles >= 2 and batch_bytes >= 2 * weight_bytes) \
        else ("arbitrary",)

    cost = pl.CostEstimate(
        flops=2 * Bp * D * Hp + 2 * Bp * Hp * Cp,
        transcendentals=0,
        bytes_accessed=(x_p.size * 4 + weight_bytes
                        + b1_p.size * 4 + b2_p.size * 4 + Bp * Cp * 4),
    )

    out_padded = pl.pallas_call(
        mlp_kernel,
        out_shape=jax.ShapeDtypeStruct((Bp, Cp), jnp.float32),
        grid=(num_tiles,),
        in_specs=[
            pl.BlockSpec((TB, D), lambda i: (i, 0)),    # x tile streams (f32)
            pl.BlockSpec((D, Hp), lambda i: (0, 0)),    # W1 resident across tiles
            pl.BlockSpec((1, Hp), lambda i: (0, 0)),    # b1 resident
            pl.BlockSpec((Hp, Cp), lambda i: (0, 0)),   # W2 resident
            pl.BlockSpec((1, Cp), lambda i: (0, 0)),    # b2 resident
        ],
        out_specs=pl.BlockSpec((TB, Cp), lambda i: (i, 0)),  # lane-dense store
        compiler_params=pltpu.CompilerParams(
            dimension_semantics=semantics,
        ),
        cost_estimate=cost,
    )(x_p, w1_p, b1_p, w2_p, b2_p)

    # Never hand out the padded slab: phantom classes / rows live in the padding.
    return out_padded[:B, :num_classes]


def reference_mlp_f32(x, w1_t, b1, w2_t, b2):
    h = jnp.maximum(x @ w1_t + b1, 0.0)
    return h @ w2_t + b2


def reference_mlp_bf16(x, w1_t, b1, w2_t, b2):
    # Same numerics as the kernel: bf16 operands, f32 accumulation, f32 biases.
    h = jnp.dot(x.astype(jnp.bfloat16), w1_t.astype(jnp.bfloat16),
                preferred_element_type=jnp.float32) + b1
    h = jnp.maximum(h, 0.0)
    return jnp.dot(h.astype(jnp.bfloat16), w2_t.astype(jnp.bfloat16),
                   preferred_element_type=jnp.float32) + b2


if __name__ == "__main__":
    # MNIST-like sizes implied by the module: num_inputs=784, hidden_size=524,
    # num_classes=10. Small batch for the demo.
    batch = 8
    num_inputs = 784
    hidden_size = 524
    num_classes = 10

    key = jax.random.PRNGKey(0)
    kx, kw1, kb1, kw2, kb2 = jax.random.split(key, 5)

    # PyTorch-default-style Linear init (uniform +/- 1/sqrt(fan_in)).
    lim1 = 1.0 / (num_inputs ** 0.5)
    lim2 = 1.0 / (hidden_size ** 0.5)
    w1_t = jax.random.uniform(kw1, (num_inputs, hidden_size), jnp.float32, -lim1, lim1)
    b1 = jax.random.uniform(kb1, (hidden_size,), jnp.float32, -lim1, lim1)
    w2_t = jax.random.uniform(kw2, (hidden_size, num_classes), jnp.float32, -lim2, lim2)
    b2 = jax.random.uniform(kb2, (num_classes,), jnp.float32, -lim2, lim2)

    x = jax.random.uniform(kx, (batch, num_inputs), jnp.float32)

    # Model-load-time prep (one-off): padded bf16 weights cached on device.
    params = prepare_params(w1_t, b1, w2_t, b2)

    fwd = jax.jit(functools.partial(linear_digit_recognizer,
                                    num_classes=num_classes, batch_tile=256))
    out = jax.block_until_ready(fwd(x, params))

    assert out.shape == (batch, num_classes)
    # Tight check vs a reference with identical bf16/f32 numerics.
    ref_bf16 = reference_mlp_bf16(x, w1_t, b1, w2_t, b2)
    assert jnp.allclose(out, ref_bf16, atol=1e-3, rtol=1e-3)
    # Looser check vs the full-f32 module semantics (bf16 weight quantization error).
    ref_f32 = reference_mlp_f32(x, w1_t, b1, w2_t, b2)
    assert jnp.allclose(out, ref_f32, atol=5e-2, rtol=5e-2)

    print("KERNEL_OK")
</pallas_src>

<mosaic_0001>
module attributes {stable_mosaic.version = 11 : i64} {
  func.func @mlp_kernel(%arg0: i32, %arg1: memref<8x784xf32, #tpu.memory_space<vmem>>, %arg2: memref<784x640xbf16, #tpu.memory_space<vmem>>, %arg3: memref<1x640xf32, #tpu.memory_space<vmem>>, %arg4: memref<640x128xbf16, #tpu.memory_space<vmem>>, %arg5: memref<1x128xf32, #tpu.memory_space<vmem>>, %arg6: memref<8x128xf32, #tpu.memory_space<vmem>>) attributes {dimension_semantics = [#tpu.dimension_semantics<arbitrary>], iteration_bounds = array<i64: 1>, scalar_prefetch = 0 : i64, scratch_operands = 0 : i64, tpu.core_type = #tpu.core_type<tc>, window_params = [{transform_indices = @transform_0, window_bounds = array<i64: 8, 784>}, {pipeline_mode = #tpu.pipeline_mode<synchronous>, transform_indices = @transform_1, window_bounds = array<i64: 784, 640>}, {pipeline_mode = #tpu.pipeline_mode<synchronous>, transform_indices = @transform_2, window_bounds = array<i64: 1, 640>}, {pipeline_mode = #tpu.pipeline_mode<synchronous>, transform_indices = @transform_3, window_bounds = array<i64: 640, 128>}, {pipeline_mode = #tpu.pipeline_mode<synchronous>, transform_indices = @transform_4, window_bounds = array<i64: 1, 128>}, {transform_indices = @transform_5, window_bounds = array<i64: 8, 128>}]} {
    %c0 = arith.constant 0 : index
    %c0_0 = arith.constant 0 : index
    %0 = vector.load %arg1[%c0, %c0_0] : memref<8x784xf32, #tpu.memory_space<vmem>>, vector<8x784xf32>
    %1 = arith.truncf %0 : vector<8x784xf32> to vector<8x784xbf16>
    %c0_1 = arith.constant 0 : index
    %c0_2 = arith.constant 0 : index
    %2 = vector.load %arg2[%c0_1, %c0_2] : memref<784x640xbf16, #tpu.memory_space<vmem>>, vector<784x640xbf16>
    %cst = arith.constant dense<0.000000e+00> : vector<8x640xf32>
    %3 = tpu.matmul %1, %2, %cst {dimension_numbers = #tpu.dot_dimension_numbers<[1], [0], [0], [1], [0, 0, 1, 1], [], []>} : vector<8x784xbf16>, vector<784x640xbf16>, vector<8x640xf32> -> vector<8x640xf32>
    %c0_3 = arith.constant 0 : index
    %c0_4 = arith.constant 0 : index
    %4 = vector.load %arg3[%c0_3, %c0_4] : memref<1x640xf32, #tpu.memory_space<vmem>>, vector<1x640xf32>
    %5 = vector.broadcast %4 : vector<1x640xf32> to vector<8x640xf32>
    %6 = arith.addf %3, %5 : vector<8x640xf32>
    %cst_5 = arith.constant 0.000000e+00 : f32
    %7 = vector.broadcast %cst_5 : f32 to vector<8x640xf32>
    %8 = arith.maximumf %6, %7 : vector<8x640xf32>
    %9 = arith.truncf %8 : vector<8x640xf32> to vector<8x640xbf16>
    %c0_6 = arith.constant 0 : index
    %c0_7 = arith.constant 0 : index
    %10 = vector.load %arg4[%c0_6, %c0_7] : memref<640x128xbf16, #tpu.memory_space<vmem>>, vector<640x128xbf16>
    %cst_8 = arith.constant dense<0.000000e+00> : vector<8x128xf32>
    %11 = tpu.matmul %9, %10, %cst_8 {dimension_numbers = #tpu.dot_dimension_numbers<[1], [0], [0], [1], [0, 0, 1, 1], [], []>} : vector<8x640xbf16>, vector<640x128xbf16>, vector<8x128xf32> -> vector<8x128xf32>
    %c0_9 = arith.constant 0 : index
    %c0_10 = arith.constant 0 : index
    %12 = vector.load %arg5[%c0_9, %c0_10] : memref<1x128xf32, #tpu.memory_space<vmem>>, vector<1x128xf32>
    %13 = vector.broadcast %12 : vector<1x128xf32> to vector<8x128xf32>
    %14 = arith.addf %11, %13 : vector<8x128xf32>
    %c0_11 = arith.constant 0 : index
    %c0_12 = arith.constant 0 : index
    %15 = vector.load %arg6[%c0_11, %c0_12] : memref<8x128xf32, #tpu.memory_space<vmem>>, vector<8x128xf32>
    tpu.vector_store %arg6[%c0_11, %c0_12], %14 {strides = array<i32>} : memref<8x128xf32, #tpu.memory_space<vmem>>, vector<8x128xf32>,
    return
  }
  func.func @transform_0(%arg0: i32) -> (i32, i32) {
    %c0_i32 = arith.constant 0 : i32
    %c0_i32_0 = arith.constant 0 : i32
    return %arg0, %c0_i32 : i32, i32
  }
  func.func @transform_1(%arg0: i32) -> (i32, i32) {
    %c0_i32 = arith.constant 0 : i32
    %c0_i32_0 = arith.constant 0 : i32
    %c0_i32_1 = arith.constant 0 : i32
    return %c0_i32, %c0_i32_0 : i32, i32
  }
  func.func @transform_2(%arg0: i32) -> (i32, i32) {
    %c0_i32 = arith.constant 0 : i32
    %c0_i32_0 = arith.constant 0 : i32
    %c0_i32_1 = arith.constant 0 : i32
    return %c0_i32, %c0_i32_0 : i32, i32
  }
  func.func @transform_3(%arg0: i32) -> (i32, i32) {
    %c0_i32 = arith.constant 0 : i32
    %c0_i32_0 = arith.constant 0 : i32
    %c0_i32_1 = arith.constant 0 : i32
    return %c0_i32, %c0_i32_0 : i32, i32
  }
  func.func @transform_4(%arg0: i32) -> (i32, i32) {
    %c0_i32 = arith.constant 0 : i32
    %c0_i32_0 = arith.constant 0 : i32
    %c0_i32_1 = arith.constant 0 : i32
    return %c0_i32, %c0_i32_0 : i32, i32
  }
  func.func @transform_5(%arg0: i32) -> (i32, i32) {
    %c0_i32 = arith.constant 0 : i32
    %c0_i32_0 = arith.constant 0 : i32
    return %arg0, %c0_i32 : i32, i32
  }
}

</mosaic_0001>

<bundles_post_ra>
// kernel: linear_digit_recognizer.1
= control target key start
LH: loop header
LB: loop body
LE: loop exit
PB: predicated region body
PF: predicated region fallthrough
CT: control target
= control target key end

     0   :  { %10 = vsyncpa [#allocation3], 0  ;;  %s4266_s0 = inlined_call_operand.hbm [shape: f32[8,784], index: 0, kind: input, shape index: {}]   ;;  %s4267_s1 = inlined_call_operand.hbm [shape: bf16[784,640], index: 1, kind: input, shape index: {}]   ;;  %s4268_s2 = inlined_call_operand.hbm [shape: f32[1,640], index: 2, kind: input, shape index: {}]   ;;  %s4269_s3 = inlined_call_operand.hbm [shape: bf16[640,128], index: 3, kind: input, shape index: {}]   ;;  %s4270_s4 = inlined_call_operand.vmem [shape: f32[1,128], index: 4, kind: input, shape index: {}]   ;;  %s4271_s5 = inlined_call_operand.hbm [shape: f32[8,128], index: 5, kind: output, shape index: {}]  }
   0x1   :  { %11 = vsyncpa [#allocation6], 0 }
   0x2   :  { %12 = vsyncpa [#allocation9], 0  ;;  %s29_s20 = sshll.u32 %s4267_s1, 4  ;;  %s30_s20 = int_to_ptr.hbm [resolvable:$true] %s29_s20 }
   0x3   :  { %13 = vsyncpa [#allocation4], 0  ;;  %s4121_s21 = smov [#allocation5]   ;;  %s19_s25 = sshll.u32 %s4266_s0, 4  ;;  %s20_s25 = int_to_ptr.hbm [resolvable:$true] %s19_s25 }
   0x4   :  { %s31_s22 = sshll.u32 %s4121_s21, 4  ;;  %s4122_s26 = smov 320   ;;  %s32_s22 = int_to_ptr.vmem [resolvable:$true] %s31_s22 }
   0x5   :  { %s4123_s27 = smov 20   ;;  %s4124_s28 = smov [#allocation2]  }
   0x6   :  { %37 = dma.hbm_to_vmem [thread:$0]  %s30_s20, 31360, %s32_s22, [#allocation6], %s4122_s26, %s4122_s26, %s4123_s27  }
   0x7   :  { %s21_s29 = sshll.u32 %s4124_s28, 4  ;;  %s43_s7 = sshll.u32 %s4268_s2, 4  ;;  %s22_s29 = int_to_ptr.vmem [resolvable:$true] %s21_s29  ;;  %s44_s7 = int_to_ptr.hbm [resolvable:$true] %s43_s7 }
   0x8   :  { %24 = dma.hbm_to_vmem [thread:$0]  %s20_s25, 896, %s22_s29, [#allocation3]  }
   0x9   :  { %s53_s9 = sshll.u32 %s4269_s3, 4  ;;  %s4125_s10 = smov [#allocation7]   ;;  %s54_s9 = int_to_ptr.hbm [resolvable:$true] %s53_s9 }
   0xa   :  { %s45_s11 = sshll.u32 %s4125_s10, 4  ;;  %s4126_s0 = smov [#allocation8]   ;;  %s46_s11 = int_to_ptr.vmem [resolvable:$true] %s45_s11 }
   0xb   :  { %48 = dma.hbm_to_vmem [thread:$0]  %s44_s7, 80, %s46_s11, [#allocation6]  }
   0xc   :  { %s55_s12 = sshll.u32 %s4126_s0, 4  ;;  %s4127_s13 = smov 64   ;;  %s56_s12 = int_to_ptr.vmem [resolvable:$true] %s55_s12 }
   0xd   :  { %s4128_s14 = smov 4  }
   0xe   :  { %61 = dma.hbm_to_vmem [thread:$0]  %s54_s9, 5120, %s56_s12, [#allocation9], %s4127_s13, %s4127_s13, %s4128_s14  }
   0xf   :  { %4113 = dma.done.wait [#allocation3], 896  }
  0x10   :  { %4114 = vsyncadd [#allocation3], 4294966400 }
  0x11   :  { %4115 = dma.done.wait [#allocation6], 31440  }
  0x12   :  { %4116 = vsyncadd [#allocation6], 4294935856 }
  0x13   :  { %4117 = dma.done.wait [#allocation9], 5120  }
  0x14   :  { %4118 = vsyncadd [#allocation9], 4294962176  ;;  %v2695_v0 = vld [vmem:[#allocation5 + $0x118] sm:$0xf]  ;;  %v3735_v1 = vld [vmem:[#allocation5 + $0x128] sm:$0xf0] }
  0x15   :  { %v2855_v2 = vld [vmem:[#allocation5 + $0x258] sm:$0xf]  ;;  %v2696_v3 = vor.u32 %v3735_v1, %v2695_v0  ;;  %v3775_v4 = vld [vmem:[#allocation5 + $0x268] sm:$0xf0]  ;;  %v2675_v11 = vld [vmem:[#allocation5 + $0xf0] sm:$0xf] }
  0x16   :  { %v3015_v5 = vld [vmem:[#allocation5 + $0x398] sm:$0xf]  ;;  %v3815_v6 = vld [vmem:[#allocation5 + $0x3a8] sm:$0xf0]  ;;  %v2856_v7 = vor.u32 %v3775_v4, %v2855_v2  ;;  %v3730_v13 = vld [vmem:[#allocation5 + $0x100] sm:$0xf0] }
  0x17   :  { %v3016_v8 = vor.u32 %v3815_v6, %v3015_v5  ;;  %v3175_v9 = vld [vmem:[#allocation5 + $0x4d8] sm:$0xf]  ;;  %v3855_v10 = vld [vmem:[#allocation5 + $0x4e8] sm:$0xf0]  ;;  %1679 = vmatpush.bf16.msra.mxu0 %v2696_v3  ;;  %v2835_v14 = vld [vmem:[#allocation5 + $0x230] sm:$0xf]  ;;  %v2676_v16 = vor.u32 %v3730_v13, %v2675_v11 }
  0x18   :  { %v3176_v12 = vor.u32 %v3855_v10, %v3175_v9  ;;  %v3770_v15 = vld [vmem:[#allocation5 + $0x240] sm:$0xf0]  ;;  %1692 = vmatpush.bf16.msra.mxu1 %v2856_v7  ;;  %v2995_v18 = vld [vmem:[#allocation5 + $0x370] sm:$0xf]  ;;  %v2655_v23 = vld [vmem:[#allocation5 + $0xc8] sm:$0xf] }
  0x19   :  { %1705 = vmatpush.bf16.msra.mxu2 %v3016_v8  ;;  %v2836_v17 = vor.u32 %v3770_v15, %v2835_v14  ;;  %v3810_v19 = vld [vmem:[#allocation5 + $0x380] sm:$0xf0]  ;;  %v3155_v20 = vld [vmem:[#allocation5 + $0x4b0] sm:$0xf]  ;;  %v3725_v24 = vld [vmem:[#allocation5 + $0xd8] sm:$0xf0] }
  0x1a   :  { %1718 = vmatpush.bf16.msra.mxu3 %v3176_v12  ;;  %v2996_v21 = vor.u32 %v3810_v19, %v2995_v18  ;;  %v3850_v22 = vld [vmem:[#allocation5 + $0x4c0] sm:$0xf0]  ;;  %v2815_v26 = vld [vmem:[#allocation5 + $0x208] sm:$0xf]  ;;  %v3765_v27 = vld [vmem:[#allocation5 + $0x218] sm:$0xf0]  ;;  %v2656_v29 = vor.u32 %v3725_v24, %v2655_v23 }
  0x1b   :  { %v3156_v25 = vor.u32 %v3850_v22, %v3155_v20  ;;  %v2975_v28 = vld [vmem:[#allocation5 + $0x348] sm:$0xf]  ;;  %1680 = vmatpush.bf16.msra.mxu0 %v2676_v16  ;;  %v3805_v30 = vld [vmem:[#allocation5 + $0x358] sm:$0xf0]  ;;  %v2816_v33 = vor.u32 %v3765_v27, %v2815_v26  ;;  %v2635_v35 = vld [vmem:[#allocation5 + $0xa0] sm:$0xf] }
  0x1c   :  { %v3135_v31 = vld [vmem:[#allocation5 + $0x488] sm:$0xf]  ;;  %v3845_v32 = vld [vmem:[#allocation5 + $0x498] sm:$0xf0]  ;;  %1693 = vmatpush.bf16.msra.mxu1 %v2836_v17  ;;  %v2976_v34 = vor.u32 %v3805_v30, %v2975_v28  ;;  %v3720_v36 = vld [vmem:[#allocation5 + $0xb0] sm:$0xf0] }
  0x1d   :  { %1706 = vmatpush.bf16.msra.mxu2 %v2996_v21  ;;  %v2795_v37 = vld [vmem:[#allocation5 + $0x1e0] sm:$0xf]  ;;  %v3136_v38 = vor.u32 %v3845_v32, %v3135_v31  ;;  %v3760_v39 = vld [vmem:[#allocation5 + $0x1f0] sm:$0xf0]  ;;  %v2636_v44 = vor.u32 %v3720_v36, %v2635_v35  ;;  %v2615_v47 = vld [vmem:[#allocation5 + $0x78] sm:$0xf] }
  0x1e   :  { %1719 = vmatpush.bf16.msra.mxu3 %v3156_v25  ;;  %v2955_v40 = vld [vmem:[#allocation5 + $0x320] sm:$0xf]  ;;  %v3800_v41 = vld [vmem:[#allocation5 + $0x330] sm:$0xf0]  ;;  %v2796_v45 = vor.u32 %v3760_v39, %v2795_v37  ;;  %v3715_v48 = vld [vmem:[#allocation5 + $0x88] sm:$0xf0] }
  0x1f   :  { %v3115_v42 = vld [vmem:[#allocation5 + $0x460] sm:$0xf]  ;;  %v3840_v43 = vld [vmem:[#allocation5 + $0x470] sm:$0xf0]  ;;  %1681 = vmatpush.bf16.msra.mxu0 %v2656_v29  ;;  %v2956_v46 = vor.u32 %v3800_v41, %v2955_v40  ;;  %v2775_v49 = vld [vmem:[#allocation5 + $0x1b8] sm:$0xf]  ;;  %v2616_v56 = vor.u32 %v3715_v48, %v2615_v47 }
  0x20   :  { %1694 = vmatpush.bf16.msra.mxu1 %v2816_v33  ;;  %v3116_v50 = vor.u32 %v3840_v43, %v3115_v42  ;;  %v3755_v51 = vld [vmem:[#allocation5 + $0x1c8] sm:$0xf0]  ;;  %v2935_v52 = vld [vmem:[#allocation5 + $0x2f8] sm:$0xf]  ;;  %v2595_v59 = vld [vmem:[#allocation5 + $0x50] sm:$0xf] }
  0x21   :  { %1707 = vmatpush.bf16.msra.mxu2 %v2976_v34  ;;  %v3795_v53 = vld [vmem:[#allocation5 + $0x308] sm:$0xf0]  ;;  %v3095_v54 = vld [vmem:[#allocation5 + $0x438] sm:$0xf]  ;;  %v2776_v57 = vor.u32 %v3755_v51, %v2775_v49  ;;  %v3710_v60 = vld [vmem:[#allocation5 + $0x60] sm:$0xf0] }
  0x22   :  { %1720 = vmatpush.bf16.msra.mxu3 %v3136_v38  ;;  %v3835_v55 = vld [vmem:[#allocation5 + $0x448] sm:$0xf0]  ;;  %v2936_v58 = vor.u32 %v3795_v53, %v2935_v52  ;;  %v2755_v61 = vld [vmem:[#allocation5 + $0x190] sm:$0xf]  ;;  %v3750_v63 = vld [vmem:[#allocation5 + $0x1a0] sm:$0xf0]  ;;  %v2596_v4 = vor.u32 %v3710_v60, %v2595_v59 }
  0x23   :  { %1682 = vmatpush.bf16.msra.mxu0 %v2636_v44  ;;  %v3096_v62 = vor.u32 %v3835_v55, %v3095_v54  ;;  %v2915_v0 = vld [vmem:[#allocation5 + $0x2d0] sm:$0xf]  ;;  %v3790_v1 = vld [vmem:[#allocation5 + $0x2e0] sm:$0xf0]  ;;  %v2756_v5 = vor.u32 %v3750_v63, %v2755_v61  ;;  %v2575_v7 = vld [vmem:[#allocation5 + $0x28] sm:$0xf] }
  0x24   :  { %1695 = vmatpush.bf16.msra.mxu1 %v2796_v45  ;;  %v3075_v2 = vld [vmem:[#allocation5 + $0x410] sm:$0xf]  ;;  %v3830_v3 = vld [vmem:[#allocation5 + $0x420] sm:$0xf0]  ;;  %v2916_v6 = vor.u32 %v3790_v1, %v2915_v0  ;;  %v3705_v8 = vld [vmem:[#allocation5 + $0x38] sm:$0xf0] }
  0x25   :  { %1708 = vmatpush.bf16.msra.mxu2 %v2956_v46  ;;  %v2735_v9 = vld [vmem:[#allocation5 + $0x168] sm:$0xf]  ;;  %v3076_v10 = vor.u32 %v3830_v3, %v3075_v2  ;;  %v3745_v11 = vld [vmem:[#allocation5 + $0x178] sm:$0xf0]  ;;  %v2576_v16 = vor.u32 %v3705_v8, %v2575_v7  ;;  %v2555_v17 = vld [vmem:[#allocation5] sm:$0xf] }
  0x26   :  { %1721 = vmatpush.bf16.msra.mxu3 %v3116_v50  ;;  %v2895_v12 = vld [vmem:[#allocation5 + $0x2a8] sm:$0xf]  ;;  %v3785_v13 = vld [vmem:[#allocation5 + $0x2b8] sm:$0xf0]  ;;  %v3700_v18 = vld [vmem:[#allocation5 + $0x10] sm:$0xf0]  ;;  %v2736_v19 = vor.u32 %v3745_v11, %v2735_v9 }
  0x27   :  { %1683 = vmatpush.bf16.msra.mxu0 %v2616_v56  ;;  %v3055_v14 = vld [vmem:[#allocation5 + $0x3e8] sm:$0xf]  ;;  %v3825_v15 = vld [vmem:[#allocation5 + $0x3f8] sm:$0xf0]  ;;  %v2896_v20 = vor.u32 %v3785_v13, %v2895_v12  ;;  %v2715_v21 = vld [vmem:[#allocation5 + $0x140] sm:$0xf]  ;;  %v2556_v31 = vor.u32 %v3700_v18, %v2555_v17 }
  0x28   :  { %1696 = vmatpush.bf16.msra.mxu1 %v2776_v57  ;;  %v3740_v22 = vld [vmem:[#allocation5 + $0x150] sm:$0xf0]  ;;  %v2875_v23 = vld [vmem:[#allocation5 + $0x280] sm:$0xf]  ;;  %v3056_v24 = vor.u32 %v3825_v15, %v3055_v14  ;;  %v3335_v28 = vld [vmem:[#allocation5 + $0x618] sm:$0xf] }
  0x29   :  { %1709 = vmatpush.bf16.msra.mxu2 %v2936_v58  ;;  %v3780_v25 = vld [vmem:[#allocation5 + $0x290] sm:$0xf0]  ;;  %v3035_v26 = vld [vmem:[#allocation5 + $0x3c0] sm:$0xf]  ;;  %v3895_v29 = vld [vmem:[#allocation5 + $0x628] sm:$0xf0]  ;;  %v2716_v35 = vor.u32 %v3740_v22, %v2715_v21 }
  0x2a   :  { %1722 = vmatpush.bf16.msra.mxu3 %v3096_v62  ;;  %v3820_v27 = vld [vmem:[#allocation5 + $0x3d0] sm:$0xf0]  ;;  %v3495_v30 = vld [vmem:[#allocation5 + $0x758] sm:$0xf]  ;;  %v3935_v32 = vld [vmem:[#allocation5 + $0x768] sm:$0xf0]  ;;  %v2876_v36 = vor.u32 %v3780_v25, %v2875_v23  ;;  %v3336_v40 = vor.u32 %v3895_v29, %v3335_v28 }
  0x2b   :  { %1684 = vmatpush.bf16.msra.mxu0 %v2596_v4  ;;  %v3733_v33 = vld [vmem:[#allocation5 + $0x11c] sm:$0xf]  ;;  %v2697_v34 = vld [vmem:[#allocation5 + $0x12c] sm:$0xf0]  ;;  %v3515_v37 = vld [vmem:[#allocation5 + $0x780] sm:$0xf]  ;;  %v3036_v39 = vor.u32 %v3820_v27, %v3035_v26  ;;  %v3496_v44 = vor.u32 %v3935_v32, %v3495_v30 }
  0x2c   :  { %1697 = vmatpush.bf16.msra.mxu1 %v2756_v5  ;;  %v3940_v38 = vld [vmem:[#allocation5 + $0x790] sm:$0xf0]  ;;  %v83_v41 = vld [vmem:[#allocation2 + $0x10] sm:$0xff]  ;;  %v2857_v43 = vld [vmem:[#allocation5 + $0x26c] sm:$0xf0]  ;;  %v2700_v45 = vor.u32 %v3733_v33, %v2697_v34  ;;  %vm1675_vm0 = vcmask 130048  }
  0x2d   :  { %1710 = vmatpush.bf16.msra.mxu2 %v2916_v6  ;;  %v3773_v42 = vld [vmem:[#allocation5 + $0x25c] sm:$0xf]  ;;  %v3315_v46 = vld [vmem:[#allocation5 + $0x5f0] sm:$0xf]  ;;  %v3890_v47 = vld [vmem:[#allocation5 + $0x600] sm:$0xf0]  ;;  %v3516_v49 = vor.u32 %v3940_v38, %v3515_v37  ;;  %v4172_v53 = vpack.c.bf16 %v83_v41, %v83_v41 }
  0x2e   :  { %1723 = vmatpush.bf16.msra.mxu3 %v3076_v10  ;;  %v3475_v48 = vld [vmem:[#allocation5 + $0x730] sm:$0xf]  ;;  %v3930_v50 = vld [vmem:[#allocation5 + $0x740] sm:$0xf0]  ;;  %v3728_v51 = vld [vmem:[#allocation5 + $0xf4] sm:$0xf]  ;;  %v2860_v56 = vor.u32 %v3773_v42, %v2857_v43  ;;  %v3316_v57 = vor.u32 %v3890_v47, %v3315_v46 }
  0x2f   :  { %1685 = vmatpush.bf16.msra.mxu0 %v2576_v16  ;;  %v2677_v52 = vld [vmem:[#allocation5 + $0x104] sm:$0xf0]  ;;  %v3768_v54 = vld [vmem:[#allocation5 + $0x234] sm:$0xf]  ;;  %v84_v61 = vld [vmem:[#allocation2 + $0x18] sm:$0xff]  ;;  %v3476_v62 = vor.u32 %v3930_v50, %v3475_v48  ;;  %s4129_s15 = smov [#allocation10]  }
  0x30   :  { %1698 = vmatpush.bf16.msra.mxu1 %v2736_v19  ;;  %v81_v55 = vld [vmem:[#allocation2] sm:$0xff]  ;;  %v2680_v63 = vor.u32 %v3728_v51, %v2677_v52  ;;  %v3885_v0 = vld [vmem:[#allocation5 + $0x5d8] sm:$0xf0]  ;;  %v4176_v3 = vpack.c.bf16 %v84_v61, %v84_v61  ;;  %v2657_v5 = vld [vmem:[#allocation5 + $0xdc] sm:$0xf0]  ;;  %s2539_s16 = sshll.u32 %s4129_s15, 4  ;;  %s2540_s16 = int_to_ptr.vmem [resolvable:$true] %s2539_s16 }
  0x31   :  { %1711 = vmatpush.bf16.msra.mxu2 %v2896_v20  ;;  %v2837_v58 = vld [vmem:[#allocation5 + $0x244] sm:$0xf0]  ;;  %v4174_v60 = vpack.c.bf16 %v81_v55, %v81_v55  ;;  %v3925_v2 = vld [vmem:[#allocation5 + $0x718] sm:$0xf0]  ;;  %v3723_v4 = vld [vmem:[#allocation5 + $0xcc] sm:$0xf] }
  0x32   :  { %1724 = vmatpush.bf16.msra.mxu3 %v3056_v24  ;;  %v3295_v59 = vld [vmem:[#allocation5 + $0x5c8] sm:$0xf]  ;;  %v82_v6 = vld [vmem:[#allocation2 + $0x8] sm:$0xff]  ;;  %v2840_v8 = vor.u32 %v3768_v54, %v2837_v58  ;;  %v3763_v10 = vld [vmem:[#allocation5 + $0x20c] sm:$0xf]  ;;  %v2660_v13 = vor.u32 %v3723_v4, %v2657_v5  ;;  %s2541_s19 = sshll.u32 %s4271_s5, 4  ;;  %s2542_s19 = int_to_ptr.hbm [resolvable:$true] %s2541_s19 }
  0x33   :  { %1686 = vmatpush.bf16.msra.mxu0 %v2556_v31  ;;  %v3455_v1 = vld [vmem:[#allocation5 + $0x708] sm:$0xf]  ;;  %v4181_v7 = vpack.c.bf16 %v82_v6, %v82_v6  ;;  %v3296_v9 = vor.u32 %v3885_v0, %v3295_v59  ;;  %v2817_v11 = vld [vmem:[#allocation5 + $0x21c] sm:$0xf0]  ;;  %v3880_v15 = vld [vmem:[#allocation5 + $0x5b0] sm:$0xf0] }
  0x34   :  { %1699 = vmatpush.bf16.msra.mxu1 %v2716_v35  ;;  %v3456_v12 = vor.u32 %v3925_v2, %v3455_v1  ;;  %v3275_v14 = vld [vmem:[#allocation5 + $0x5a0] sm:$0xf]  ;;  %v3920_v17 = vld [vmem:[#allocation5 + $0x6f0] sm:$0xf0]  ;;  %v3718_v18 = vld [vmem:[#allocation5 + $0xa4] sm:$0xf]  ;;  %v2820_v20 = vor.u32 %v3763_v10, %v2817_v11 }
  0x35   :  { %1712 = vmatpush.bf16.msra.mxu2 %v2876_v36  ;;  %v3435_v16 = vld [vmem:[#allocation5 + $0x6e0] sm:$0xf]  ;;  %v2637_v19 = vld [vmem:[#allocation5 + $0xb4] sm:$0xf0]  ;;  %v3276_v21 = vor.u32 %v3880_v15, %v3275_v14  ;;  %v3758_v22 = vld [vmem:[#allocation5 + $0x1e4] sm:$0xf] }
  0x36   :  { %1725 = vmatpush.bf16.msra.mxu3 %v3036_v39  ;;  %1687 = vmatmul.bf16.vlgmr.msra.gmra.mxu0 %v4174_v60  ;;  %v2797_v23 = vld [vmem:[#allocation5 + $0x1f4] sm:$0xf0]  ;;  %v3436_v24 = vor.u32 %v3920_v17, %v3435_v16  ;;  %v2640_v25 = vor.u32 %v3718_v18, %v2637_v19  ;;  %v3875_v27 = vld [vmem:[#allocation5 + $0x588] sm:$0xf0]  ;;  %v3713_v30 = vld [vmem:[#allocation5 + $0x7c] sm:$0xf] }
  0x37   :  { %1731 = vmatpush.bf16.msrb.mxu0 %v3336_v40  ;;  %1700 = vmatmul.bf16.vlgmr.msra.gmra.mxu1 %v4181_v7  ;;  %v3255_v26 = vld [vmem:[#allocation5 + $0x578] sm:$0xf]  ;;  %v3915_v29 = vld [vmem:[#allocation5 + $0x6c8] sm:$0xf0]  ;;  %v2617_v31 = vld [vmem:[#allocation5 + $0x8c] sm:$0xf0]  ;;  %v2800_v32 = vor.u32 %v3758_v22, %v2797_v23 }
  0x38   :  { %1744 = vmatpush.bf16.msrb.mxu1 %v3496_v44  ;;  %1713 = vmatmul.bf16.vlgmr.msra.gmra.mxu2 %v4172_v53  ;;  %v3415_v28 = vld [vmem:[#allocation5 + $0x6b8] sm:$0xf]  ;;  %v3256_v33 = vor.u32 %v3875_v27, %v3255_v26  ;;  %v3753_v34 = vld [vmem:[#allocation5 + $0x1bc] sm:$0xf]  ;;  %v2777_v35 = vld [vmem:[#allocation5 + $0x1cc] sm:$0xf0]  ;;  %v2620_v38 = vor.u32 %v3713_v30, %v2617_v31 }
  0x39   :  { %1764 = vmatpush.bf16.msrb.mxu2 %v3516_v49  ;;  %1726 = vmatmul.bf16.vlgmr.msra.gmra.mxu3 %v4176_v3  ;;  %v87_v36 = vld [vmem:[#allocation2 + $0x30] sm:$0xff]  ;;  %v3416_v37 = vor.u32 %v3915_v29, %v3415_v28  ;;  %v3235_v39 = vld [vmem:[#allocation5 + $0x550] sm:$0xf]  ;;  %v3870_v40 = vld [vmem:[#allocation5 + $0x560] sm:$0xf0]  ;;  %v2780_v46 = vor.u32 %v3753_v34, %v2777_v35 }
  0x3a   :  { %1770 = vmatpush.bf16.msrb.mxu3 %v2700_v45  ;;  %v3395_v41 = vld [vmem:[#allocation5 + $0x690] sm:$0xf]  ;;  %v3910_v42 = vld [vmem:[#allocation5 + $0x6a0] sm:$0xf0]  ;;  %v3708_v43 = vld [vmem:[#allocation5 + $0x54] sm:$0xf]  ;;  %v4184_v45 = vpack.c.bf16 %v87_v36, %v87_v36  ;;  %v3236_v47 = vor.u32 %v3870_v40, %v3235_v39 }
  0x3b   :  { %1732 = vmatpush.bf16.msrb.mxu0 %v3316_v57  ;;  %v2597_v44 = vld [vmem:[#allocation5 + $0x64] sm:$0xf0]  ;;  %v3748_v48 = vld [vmem:[#allocation5 + $0x194] sm:$0xf]  ;;  %v3396_v50 = vor.u32 %v3910_v42, %v3395_v41  ;;  %v3865_v54 = vld [vmem:[#allocation5 + $0x538] sm:$0xf0] }
  0x3c   :  { %1745 = vmatpush.bf16.msrb.mxu1 %v3476_v62  ;;  %v2757_v49 = vld [vmem:[#allocation5 + $0x1a4] sm:$0xf0]  ;;  %v2600_v51 = vor.u32 %v3708_v43, %v2597_v44  ;;  %v3703_v57 = vld [vmem:[#allocation5 + $0x2c] sm:$0xf]  ;;  %v2577_v58 = vld [vmem:[#allocation5 + $0x3c] sm:$0xf0] }
  0x3d   :  { %1783 = vmatpush.bf16.msra.mxu2 %v2860_v56  ;;  %v3215_v52 = vld [vmem:[#allocation5 + $0x528] sm:$0xf]  ;;  %v3905_v56 = vld [vmem:[#allocation5 + $0x678] sm:$0xf0]  ;;  %v2760_v59 = vor.u32 %v3748_v48, %v2757_v49  ;;  %v3743_v62 = vld [vmem:[#allocation5 + $0x16c] sm:$0xf]  ;;  %v2580_v2 = vor.u32 %v3703_v57, %v2577_v58 }
  0x3e   :  { %1771 = vmatpush.bf16.msrb.mxu3 %v2680_v63  ;;  %v3375_v55 = vld [vmem:[#allocation5 + $0x668] sm:$0xf]  ;;  %v3216_v61 = vor.u32 %v3865_v54, %v3215_v52  ;;  %v2737_v63 = vld [vmem:[#allocation5 + $0x17c] sm:$0xf0]  ;;  %v3860_v4 = vld [vmem:[#allocation5 + $0x510] sm:$0xf0] }
  0x3f   :  { %1733 = vmatpush.bf16.msrb.mxu0 %v3296_v9  ;;  %v3195_v0 = vld [vmem:[#allocation5 + $0x500] sm:$0xf]  ;;  %v3376_v1 = vor.u32 %v3905_v56, %v3375_v55  ;;  %v3900_v6 = vld [vmem:[#allocation5 + $0x650] sm:$0xf0]  ;;  %v2557_v9 = vld [vmem:[#allocation5 + $0x14] sm:$0xf0]  ;;  %v2740_v14 = vor.u32 %v3743_v62, %v2737_v63 }
  0x40   :  { %1746 = vmatpush.bf16.msrb.mxu1 %v3456_v12  ;;  %v3355_v5 = vld [vmem:[#allocation5 + $0x640] sm:$0xf]  ;;  %v3813_v10 = vld [vmem:[#allocation5 + $0x39c] sm:$0xf]  ;;  %v3017_v11 = vld [vmem:[#allocation5 + $0x3ac] sm:$0xf0]  ;;  %v3196_v15 = vor.u32 %v3860_v4, %v3195_v0 }
  0x41   :  { %1784 = vmatpush.bf16.msra.mxu2 %v2840_v8  ;;  %v3698_v8 = vld [vmem:[#allocation5 + $0x4] sm:$0xf]  ;;  %v3853_v12 = vld [vmem:[#allocation5 + $0x4dc] sm:$0xf]  ;;  %v3337_v17 = vld [vmem:[#allocation5 + $0x62c] sm:$0xf0]  ;;  %v3356_v19 = vor.u32 %v3900_v6, %v3355_v5 }
  0x42   :  { %1772 = vmatpush.bf16.msrb.mxu3 %v2660_v13  ;;  %v3177_v13 = vld [vmem:[#allocation5 + $0x4ec] sm:$0xf0]  ;;  %v3893_v16 = vld [vmem:[#allocation5 + $0x61c] sm:$0xf]  ;;  %v85_v18 = vld [vmem:[#allocation2 + $0x20] sm:$0xff] }
  0x43   :  { %1734 = vmatpush.bf16.msrb.mxu0 %v3276_v21  ;;  %v3738_v21 = vld [vmem:[#allocation5 + $0x144] sm:$0xf]  ;;  %v2717_v22 = vld [vmem:[#allocation5 + $0x154] sm:$0xf0]  ;;  %v86_v23 = vld [vmem:[#allocation2 + $0x28] sm:$0xff]  ;;  %v3340_v29 = vor.u32 %v3893_v16, %v3337_v17  ;;  %v4188_v30 = vpack.c.bf16 %v85_v18, %v85_v18 }
  0x44   :  { %1747 = vmatpush.bf16.msrb.mxu1 %v3436_v24  ;;  %v3020_v24 = vor.u32 %v3813_v10, %v3017_v11  ;;  %v3933_v26 = vld [vmem:[#allocation5 + $0x75c] sm:$0xf]  ;;  %v3497_v27 = vld [vmem:[#allocation5 + $0x76c] sm:$0xf0]  ;;  %v3808_v28 = vld [vmem:[#allocation5 + $0x374] sm:$0xf]  ;;  %v2720_v34 = vor.u32 %v3738_v21, %v2717_v22  ;;  %v4190_v35 = vpack.c.bf16 %v86_v23, %v86_v23 }
  0x45   :  { %1785 = vmatpush.bf16.msra.mxu2 %v2820_v20  ;;  %v2560_v20 = vor.u32 %v3698_v8, %v2557_v9  ;;  %v2997_v31 = vld [vmem:[#allocation5 + $0x384] sm:$0xf0]  ;;  %v3888_v36 = vld [vmem:[#allocation5 + $0x5f4] sm:$0xf]  ;;  %v3803_v43 = vld [vmem:[#allocation5 + $0x34c] sm:$0xf] }
  0x46   :  { %1773 = vmatpush.bf16.msrb.mxu3 %v2640_v25  ;;  %v3180_v25 = vor.u32 %v3853_v12, %v3177_v13  ;;  %v3000_v39 = vor.u32 %v3808_v28, %v2997_v31  ;;  %v3928_v41 = vld [vmem:[#allocation5 + $0x734] sm:$0xf]  ;;  %v3477_v42 = vld [vmem:[#allocation5 + $0x744] sm:$0xf0]  ;;  %v3137_v48 = vld [vmem:[#allocation5 + $0x49c] sm:$0xf0] }
  0x47   :  { %1735 = vmatpush.bf16.msrb.mxu0 %v3256_v33  ;;  %v3157_v33 = vld [vmem:[#allocation5 + $0x4c4] sm:$0xf0]  ;;  %v3883_v49 = vld [vmem:[#allocation5 + $0x5cc] sm:$0xf]  ;;  %v3457_v56 = vld [vmem:[#allocation5 + $0x71c] sm:$0xf0] }
  0x48   :  { %1748 = vmatpush.bf16.msrb.mxu1 %v3416_v37  ;;  %3533 = vmatmul.msk.bf16.vlgmr.msrb.gmra.mxu2 %vm1675_vm0, %v4184_v45  ;;  %v3317_v37 = vld [vmem:[#allocation5 + $0x604] sm:$0xf0]  ;;  %v3923_v55 = vld [vmem:[#allocation5 + $0x70c] sm:$0xf]  ;;  %v3798_v57 = vld [vmem:[#allocation5 + $0x324] sm:$0xf] }
  0x49   :  { %1786 = vmatpush.bf16.msra.mxu2 %v2800_v32  ;;  %v3848_v32 = vld [vmem:[#allocation5 + $0x4b4] sm:$0xf]  ;;  %v3320_v44 = vor.u32 %v3888_v36, %v3317_v37  ;;  %v3117_v62 = vld [vmem:[#allocation5 + $0x474] sm:$0xf0]  ;;  %v3878_v63 = vld [vmem:[#allocation5 + $0x5a4] sm:$0xf] }
  0x4a   :  { %1774 = vmatpush.bf16.msrb.mxu3 %v2620_v38  ;;  %v3500_v38 = vor.u32 %v3933_v26, %v3497_v27  ;;  %v3160_v40 = vor.u32 %v3848_v32, %v3157_v33  ;;  %v3277_v0 = vld [vmem:[#allocation5 + $0x5b4] sm:$0xf0]  ;;  %v3918_v5 = vld [vmem:[#allocation5 + $0x6e4] sm:$0xf]  ;;  %v3793_v8 = vld [vmem:[#allocation5 + $0x2fc] sm:$0xf] }
  0x4b   :  { %1736 = vmatpush.bf16.msrb.mxu0 %v3236_v47  ;;  %v3843_v47 = vld [vmem:[#allocation5 + $0x48c] sm:$0xf]  ;;  %v3437_v6 = vld [vmem:[#allocation5 + $0x6f4] sm:$0xf0]  ;;  %v3280_v9 = vor.u32 %v3878_v63, %v3277_v0  ;;  %v2937_v10 = vld [vmem:[#allocation5 + $0x30c] sm:$0xf0] }
  0x4c   :  { %1749 = vmatpush.bf16.msrb.mxu1 %v3396_v50  ;;  %v3297_v50 = vld [vmem:[#allocation5 + $0x5dc] sm:$0xf0]  ;;  %v3140_v54 = vor.u32 %v3843_v47, %v3137_v48  ;;  %v3833_v11 = vld [vmem:[#allocation5 + $0x43c] sm:$0xf]  ;;  %v3097_v12 = vld [vmem:[#allocation5 + $0x44c] sm:$0xf0]  ;;  %v2940_v16 = vor.u32 %v3793_v8, %v2937_v10 }
  0x4d   :  { %1787 = vmatpush.bf16.msra.mxu2 %v2780_v46  ;;  %v2977_v46 = vld [vmem:[#allocation5 + $0x35c] sm:$0xf0]  ;;  %v3300_v58 = vor.u32 %v3883_v49, %v3297_v50  ;;  %v3873_v13 = vld [vmem:[#allocation5 + $0x57c] sm:$0xf]  ;;  %v3100_v17 = vor.u32 %v3833_v11, %v3097_v12  ;;  %v2917_v22 = vld [vmem:[#allocation5 + $0x2e4] sm:$0xf0] }
  0x4e   :  { %1775 = vmatpush.bf16.msrb.mxu3 %v2600_v51  ;;  %v3480_v51 = vor.u32 %v3928_v41, %v3477_v42  ;;  %v2980_v52 = vor.u32 %v3803_v43, %v2977_v46  ;;  %v3913_v18 = vld [vmem:[#allocation5 + $0x6bc] sm:$0xf]  ;;  %v3828_v23 = vld [vmem:[#allocation5 + $0x414] sm:$0xf]  ;;  %v3237_v26 = vld [vmem:[#allocation5 + $0x564] sm:$0xf0] }
  0x4f   :  { %1737 = vmatpush.bf16.msrb.mxu0 %v3216_v61  ;;  %v3838_v61 = vld [vmem:[#allocation5 + $0x464] sm:$0xf]  ;;  %v3908_v31 = vld [vmem:[#allocation5 + $0x694] sm:$0xf]  ;;  %v3397_v32 = vld [vmem:[#allocation5 + $0x6a4] sm:$0xf0] }
  0x50   :  { %1750 = vmatpush.bf16.msrb.mxu1 %v3376_v1  ;;  %v3460_v1 = vor.u32 %v3923_v55, %v3457_v56  ;;  %v3120_v4 = vor.u32 %v3838_v61, %v3117_v62  ;;  %v3783_v33 = vld [vmem:[#allocation5 + $0x2ac] sm:$0xf]  ;;  %v2897_v36 = vld [vmem:[#allocation5 + $0x2bc] sm:$0xf0]  ;;  %v3400_v41 = vor.u32 %v3908_v31, %v3397_v32  ;;  %v2877_v48 = vld [vmem:[#allocation5 + $0x294] sm:$0xf0] }
  0x51   :  { %1788 = vmatpush.bf16.msra.mxu2 %v2760_v59  ;;  %v2957_v59 = vld [vmem:[#allocation5 + $0x334] sm:$0xf0]  ;;  %v3823_v37 = vld [vmem:[#allocation5 + $0x3ec] sm:$0xf]  ;;  %v3377_v43 = vld [vmem:[#allocation5 + $0x67c] sm:$0xf0]  ;;  %v2900_v46 = vor.u32 %v3783_v33, %v2897_v36 }
  0x52   :  { %1776 = vmatpush.bf16.msrb.mxu3 %v2580_v2  ;;  %v2960_v2 = vor.u32 %v3798_v57, %v2957_v59  ;;  %v3903_v42 = vld [vmem:[#allocation5 + $0x66c] sm:$0xf]  ;;  %v3818_v49 = vld [vmem:[#allocation5 + $0x3c4] sm:$0xf]  ;;  %v3037_v50 = vld [vmem:[#allocation5 + $0x3d4] sm:$0xf0] }
  0x53   :  { %1738 = vmatpush.bf16.msrb.mxu0 %v3196_v15  ;;  %v3440_v15 = vor.u32 %v3918_v5, %v3437_v6  ;;  %v2703_v55 = vld [vmem:[#allocation5 + $0x120] sm:$0xf]  ;;  %v3736_v56 = vld [vmem:[#allocation5 + $0x130] sm:$0xf0]  ;;  %v3040_v0 = vor.u32 %v3818_v49, %v3037_v50  ;;  %v3938_v6 = vld [vmem:[#allocation5 + $0x784] sm:$0xf] }
  0x54   :  { %1751 = vmatpush.bf16.msrb.mxu1 %v3356_v19  ;;  %v3417_v19 = vld [vmem:[#allocation5 + $0x6cc] sm:$0xf0]  ;;  %v2863_v57 = vld [vmem:[#allocation5 + $0x260] sm:$0xf]  ;;  %v3776_v59 = vld [vmem:[#allocation5 + $0x270] sm:$0xf0]  ;;  %v2704_v5 = vor.u32 %v3736_v56, %v2703_v55 }
  0x55   :  { %1789 = vmatpush.bf16.msra.mxu2 %v2740_v14  ;;  %v3257_v14 = vld [vmem:[#allocation5 + $0x58c] sm:$0xf0]  ;;  %v3420_v27 = vor.u32 %v3913_v18, %v3417_v19  ;;  %v3023_v61 = vld [vmem:[#allocation5 + $0x3a0] sm:$0xf]  ;;  %v3816_v62 = vld [vmem:[#allocation5 + $0x3b0] sm:$0xf0] }
  0x56   :  { %1777 = vmatpush.bf16.msrb.mxu3 %v2560_v20  ;;  %1739 = vmatmul.bf16.vlgmr.msrb.gmra.mxu0 %v4188_v30  ;;  %v3788_v20 = vld [vmem:[#allocation5 + $0x2d4] sm:$0xf]  ;;  %v3260_v21 = vor.u32 %v3873_v13, %v3257_v14  ;;  %v3517_v8 = vld [vmem:[#allocation5 + $0x794] sm:$0xf0]  ;;  %v3024_v10 = vor.u32 %v3816_v62, %v3023_v61  ;;  %v3731_v12 = vld [vmem:[#allocation5 + $0x108] sm:$0xf0] }
  0x57   :  { %1796 = vmatpush.bf16.msra.mxu0 %v3020_v24  ;;  %1752 = vmatmul.bf16.vlgmr.msrb.gmra.mxu1 %v4190_v35  ;;  %v3077_v24 = vld [vmem:[#allocation5 + $0x424] sm:$0xf0]  ;;  %v2920_v28 = vor.u32 %v3788_v20, %v2917_v22  ;;  %v2683_v11 = vld [vmem:[#allocation5 + $0xf8] sm:$0xf]  ;;  %v3520_v18 = vor.u32 %v3938_v6, %v3517_v8  ;;  %v3183_v20 = vld [vmem:[#allocation5 + $0x4e0] sm:$0xf] }
  0x58   :  { %1809 = vmatpush.bf16.msra.mxu1 %v3180_v25  ;;  %v3868_v25 = vld [vmem:[#allocation5 + $0x554] sm:$0xf]  ;;  %v2843_v13 = vld [vmem:[#allocation5 + $0x238] sm:$0xf]  ;;  %v2684_v19 = vor.u32 %v3731_v12, %v2683_v11  ;;  %v2943_v56 = vld [vmem:[#allocation5 + $0x300] sm:$0xf] }
  0x59   :  { %1790 = vmatpush.bf16.msra.mxu2 %v2720_v34  ;;  %1778 = vmatmul.bf16.vlgmr.msrb.gmra.mxu3 %v4174_v60  ;;  %v3240_v34 = vor.u32 %v3868_v25, %v3237_v26  ;;  %v3726_v25 = vld [vmem:[#allocation5 + $0xe0] sm:$0xf0]  ;;  %v2823_v26 = vld [vmem:[#allocation5 + $0x210] sm:$0xf]  ;;  %v3163_v33 = vld [vmem:[#allocation5 + $0x4b8] sm:$0xf] }
  0x5a   :  { %1822 = vmatpush.bf16.msra.mxu3 %v3340_v29  ;;  %v3080_v29 = vor.u32 %v3828_v23, %v3077_v24  ;;  %v2663_v24 = vld [vmem:[#allocation5 + $0xd0] sm:$0xf]  ;;  %v3756_v55 = vld [vmem:[#allocation5 + $0x1d0] sm:$0xf0]  ;;  %v3123_v61 = vld [vmem:[#allocation5 + $0x468] sm:$0xf] }
  0x5b   :  { %1797 = vmatpush.bf16.msra.mxu0 %v3000_v39  ;;  %v3863_v39 = vld [vmem:[#allocation5 + $0x52c] sm:$0xf]  ;;  %v2664_v32 = vor.u32 %v3726_v25, %v2663_v24  ;;  %v3841_v62 = vld [vmem:[#allocation5 + $0x478] sm:$0xf0]  ;;  %v2923_v6 = vld [vmem:[#allocation5 + $0x2d8] sm:$0xf] }
  0x5c   :  { %1810 = vmatpush.bf16.msra.mxu1 %v3160_v40  ;;  %1791 = vmatmul.bf16.vlgmr.msra.gmra.mxu2 %v4181_v7  ;;  %v3217_v40 = vld [vmem:[#allocation5 + $0x53c] sm:$0xf0]  ;;  %v3791_v8 = vld [vmem:[#allocation5 + $0x2e8] sm:$0xf0]  ;;  %v3836_v12 = vld [vmem:[#allocation5 + $0x450] sm:$0xf0] }
  0x5d   :  { %1835 = vmatpush.bf16.msrb.mxu2 %v3500_v38  ;;  %v3057_v38 = vld [vmem:[#allocation5 + $0x3fc] sm:$0xf0]  ;;  %v3831_v24 = vld [vmem:[#allocation5 + $0x428] sm:$0xf0]  ;;  %v2563_v25 = vld [vmem:[#allocation5 + $0x8] sm:$0xf] }
  0x5e   :  { %1823 = vmatpush.bf16.msra.mxu3 %v3320_v44  ;;  %v3778_v44 = vld [vmem:[#allocation5 + $0x284] sm:$0xf]  ;;  %v3060_v47 = vor.u32 %v3823_v37, %v3057_v38  ;;  %v2643_v38 = vld [vmem:[#allocation5 + $0xa8] sm:$0xf]  ;;  %v3103_v11 = vld [vmem:[#allocation5 + $0x440] sm:$0xf] }
  0x5f   :  { %1798 = vmatpush.bf16.msra.mxu0 %v2980_v52  ;;  %v3858_v52 = vld [vmem:[#allocation5 + $0x504] sm:$0xf]  ;;  %v2880_v63 = vor.u32 %v3778_v44, %v2877_v48 }
  0x60   :  { %1811 = vmatpush.bf16.msra.mxu1 %v3140_v54  ;;  %v3197_v54 = vld [vmem:[#allocation5 + $0x514] sm:$0xf0]  ;;  %v3846_v48 = vld [vmem:[#allocation5 + $0x4a0] sm:$0xf0] }
  0x61   :  { %1836 = vmatpush.bf16.msrb.mxu2 %v3480_v51  ;;  %v3220_v51 = vor.u32 %v3863_v39, %v3217_v40  ;;  %v3721_v39 = vld [vmem:[#allocation5 + $0xb8] sm:$0xf0]  ;;  %v2803_v40 = vld [vmem:[#allocation5 + $0x1e8] sm:$0xf] }
  0x62   :  { %1824 = vmatpush.bf16.msra.mxu3 %v3300_v58  ;;  %v3380_v58 = vor.u32 %v3903_v42, %v3377_v43  ;;  %v2963_v42 = vld [vmem:[#allocation5 + $0x328] sm:$0xf]  ;;  %v3801_v43 = vld [vmem:[#allocation5 + $0x338] sm:$0xf0] }
  0x63   :  { %1799 = vmatpush.bf16.msra.mxu0 %v2960_v2  ;;  %v3357_v2 = vld [vmem:[#allocation5 + $0x654] sm:$0xf0]  ;;  %v2964_v50 = vor.u32 %v3801_v43, %v2963_v42  ;;  %v3826_v42 = vld [vmem:[#allocation5 + $0x400] sm:$0xf0]  ;;  %v3523_v43 = vld [vmem:[#allocation5 + $0x788] sm:$0xf] }
  0x64   :  { %1812 = vmatpush.bf16.msra.mxu1 %v3120_v4  ;;  %v3200_v4 = vor.u32 %v3858_v52, %v3197_v54  ;;  %v3716_v52 = vld [vmem:[#allocation5 + $0x90] sm:$0xf0]  ;;  %v2783_v54 = vld [vmem:[#allocation5 + $0x1c0] sm:$0xf] }
  0x65   :  { %1837 = vmatpush.bf16.msrb.mxu2 %v3460_v1  ;;  %v3898_v1 = vld [vmem:[#allocation5 + $0x644] sm:$0xf] }
  0x66   :  { %1825 = vmatpush.bf16.msra.mxu3 %v3280_v9  ;;  %v2864_v9 = vor.u32 %v3776_v59, %v2863_v57  ;;  %v3360_v14 = vor.u32 %v3898_v1, %v3357_v2  ;;  %v3796_v57 = vld [vmem:[#allocation5 + $0x310] sm:$0xf0]  ;;  %v2603_v1 = vld [vmem:[#allocation5 + $0x58] sm:$0xf]  ;;  %v3711_v2 = vld [vmem:[#allocation5 + $0x68] sm:$0xf0] }
  0x67   :  { %1800 = vmatpush.bf16.msra.mxu0 %v2940_v16  ;;  %v3003_v16 = vld [vmem:[#allocation5 + $0x378] sm:$0xf] }
  0x68   :  { %1813 = vmatpush.bf16.msra.mxu1 %v3100_v17  ;;  %v3811_v17 = vld [vmem:[#allocation5 + $0x388] sm:$0xf0] }
  0x69   :  { %1838 = vmatpush.bf16.msrb.mxu2 %v3440_v15  ;;  %v3771_v15 = vld [vmem:[#allocation5 + $0x248] sm:$0xf0]  ;;  %v3004_v23 = vor.u32 %v3811_v17, %v3003_v16  ;;  %v3706_v16 = vld [vmem:[#allocation5 + $0x40] sm:$0xf0]  ;;  %v2743_v17 = vld [vmem:[#allocation5 + $0x170] sm:$0xf] }
  0x6a   :  { %1826 = vmatpush.bf16.msra.mxu3 %v3260_v21  ;;  %v3856_v21 = vld [vmem:[#allocation5 + $0x4f0] sm:$0xf0]  ;;  %v2844_v22 = vor.u32 %v3771_v15, %v2843_v13  ;;  %v2583_v15 = vld [vmem:[#allocation5 + $0x30] sm:$0xf] }
  0x6b   :  { %1801 = vmatpush.bf16.msra.mxu0 %v2920_v28  ;;  %v2983_v28 = vld [vmem:[#allocation5 + $0x350] sm:$0xf]  ;;  %v3184_v31 = vor.u32 %v3856_v21, %v3183_v20  ;;  %v3786_v20 = vld [vmem:[#allocation5 + $0x2c0] sm:$0xf0]  ;;  %v3104_v21 = vor.u32 %v3836_v12, %v3103_v11 }
  0x6c   :  { %1814 = vmatpush.bf16.msra.mxu1 %v3080_v29  ;;  %v3806_v29 = vld [vmem:[#allocation5 + $0x360] sm:$0xf0] }
  0x6d   :  { %1839 = vmatpush.bf16.msrb.mxu2 %v3420_v27  ;;  %v3766_v27 = vld [vmem:[#allocation5 + $0x220] sm:$0xf0]  ;;  %v2984_v37 = vor.u32 %v3806_v29, %v2983_v28  ;;  %v2723_v29 = vld [vmem:[#allocation5 + $0x148] sm:$0xf] }
  0x6e   :  { %1827 = vmatpush.bf16.msra.mxu3 %v3240_v34  ;;  %v3851_v34 = vld [vmem:[#allocation5 + $0x4c8] sm:$0xf0]  ;;  %v2824_v36 = vor.u32 %v3766_v27, %v2823_v26  ;;  %v3701_v26 = vld [vmem:[#allocation5 + $0x18] sm:$0xf0]  ;;  %v3926_v11 = vld [vmem:[#allocation5 + $0x720] sm:$0xf0] }
  0x6f   :  { %1802 = vmatpush.bf16.msra.mxu0 %v2900_v46  ;;  %v3164_v44 = vor.u32 %v3851_v34, %v3163_v33  ;;  %v2644_v46 = vor.u32 %v3721_v39, %v2643_v38  ;;  %v3781_v33 = vld [vmem:[#allocation5 + $0x298] sm:$0xf0]  ;;  %v3343_v34 = vld [vmem:[#allocation5 + $0x620] sm:$0xf]  ;;  %v3936_v39 = vld [vmem:[#allocation5 + $0x770] sm:$0xf0] }
  0x70   :  { %1815 = vmatpush.bf16.msra.mxu1 %v3060_v47  ;;  %v3143_v47 = vld [vmem:[#allocation5 + $0x490] sm:$0xf]  ;;  %v3503_v38 = vld [vmem:[#allocation5 + $0x760] sm:$0xf] }
  0x71   :  { %1840 = vmatpush.bf16.msrb.mxu2 %v3400_v41  ;;  %v3761_v41 = vld [vmem:[#allocation5 + $0x1f8] sm:$0xf0] }
  0x72   :  { %1828 = vmatpush.bf16.msra.mxu3 %v3220_v51  ;;  %v2804_v49 = vor.u32 %v3761_v41, %v2803_v40  ;;  %v2623_v51 = vld [vmem:[#allocation5 + $0x80] sm:$0xf]  ;;  %v3063_v40 = vld [vmem:[#allocation5 + $0x3f0] sm:$0xf]  ;;  %v2564_v41 = vor.u32 %v3701_v26, %v2563_v25  ;;  %v3724_v26 = vld [vmem:[#allocation5 + $0xd4] sm:$0xf] }
  0x73   :  { %1803 = vmatpush.bf16.msra.mxu0 %v2880_v63  ;;  %v2624_v59 = vor.u32 %v3716_v52, %v2623_v51  ;;  %v2784_v63 = vor.u32 %v3756_v55, %v2783_v54  ;;  %v2865_v51 = vld [vmem:[#allocation5 + $0x274] sm:$0xf0]  ;;  %v3064_v54 = vor.u32 %v3826_v42, %v3063_v40  ;;  %v3719_v40 = vld [vmem:[#allocation5 + $0xac] sm:$0xf] }
  0x74   :  { %1816 = vmatpush.bf16.msra.mxu1 %v3040_v0  ;;  %v2944_v0 = vor.u32 %v3796_v57, %v2943_v56  ;;  %v3323_v52 = vld [vmem:[#allocation5 + $0x5f8] sm:$0xf]  ;;  %v3891_v56 = vld [vmem:[#allocation5 + $0x608] sm:$0xf0] }
  0x75   :  { %1841 = vmatpush.bf16.msrb.mxu2 %v3380_v58  ;;  %v3144_v58 = vor.u32 %v3846_v48, %v3143_v47  ;;  %v3483_v57 = vld [vmem:[#allocation5 + $0x738] sm:$0xf] }
  0x76   :  { %1829 = vmatpush.bf16.msra.mxu3 %v3200_v4  ;;  %1804 = vmatmul.bf16.vlgmr.msra.gmra.mxu0 %v4172_v53  ;;  %v2763_v4 = vld [vmem:[#allocation5 + $0x198] sm:$0xf] }
  0x77   :  { %1887 = vmatpush.bf16.msrb.mxu0 %v3024_v10  ;;  %1817 = vmatmul.bf16.vlgmr.msra.gmra.mxu1 %v4176_v3  ;;  %v2604_v10 = vor.u32 %v3711_v2, %v2603_v1  ;;  %v3324_v1 = vor.u32 %v3891_v56, %v3323_v52 }
  0x78   :  { %1861 = vmatpush.bf16.msrb.mxu1 %v2704_v5  ;;  %v3751_v5 = vld [vmem:[#allocation5 + $0x1a8] sm:$0xf0] }
  0x79   :  { %1842 = vmatpush.bf16.msrb.mxu2 %v3360_v14  ;;  %1830 = vmatmul.bf16.vlgmr.msra.gmra.mxu3 %v4188_v30  ;;  %v2764_v13 = vor.u32 %v3751_v5, %v2763_v4  ;;  %v2924_v14 = vor.u32 %v3791_v8, %v2923_v6  ;;  %v3769_v4 = vld [vmem:[#allocation5 + $0x23c] sm:$0xf]  ;;  %v2845_v5 = vld [vmem:[#allocation5 + $0x24c] sm:$0xf0] }
  0x7a   :  { %1874 = vmatpush.bf16.msrb.mxu3 %v2864_v9  ;;  %v3124_v9 = vor.u32 %v3841_v62, %v3123_v61  ;;  %v3821_v61 = vld [vmem:[#allocation5 + $0x3d8] sm:$0xf0]  ;;  %v3303_v6 = vld [vmem:[#allocation5 + $0x5d0] sm:$0xf] }
  0x7b   :  { %1888 = vmatpush.bf16.msrb.mxu0 %v3004_v23  ;;  %v2584_v23 = vor.u32 %v3706_v16, %v2583_v15  ;;  %v2685_v15 = vld [vmem:[#allocation5 + $0x10c] sm:$0xf0] }
  0x7c   :  { %1862 = vmatpush.bf16.msrb.mxu1 %v2684_v19  ;;  %1843 = vmatmul.bf16.vlgmr.msrb.gmra.mxu2 %v4190_v35  ;;  %v2903_v19 = vld [vmem:[#allocation5 + $0x2b0] sm:$0xf] }
  0x7d   :  { %1855 = vmatpush.bf16.msra.mxu2 %v3520_v18  ;;  %v3746_v18 = vld [vmem:[#allocation5 + $0x180] sm:$0xf0]  ;;  %v2904_v28 = vor.u32 %v3786_v20, %v2903_v19  ;;  %v2825_v19 = vld [vmem:[#allocation5 + $0x224] sm:$0xf0] }
  0x7e   :  { %1875 = vmatpush.bf16.msrb.mxu3 %v2844_v22  ;;  %v3083_v22 = vld [vmem:[#allocation5 + $0x418] sm:$0xf]  ;;  %v2744_v27 = vor.u32 %v3746_v18, %v2743_v17  ;;  %v3764_v18 = vld [vmem:[#allocation5 + $0x214] sm:$0xf]  ;;  %v3283_v20 = vld [vmem:[#allocation5 + $0x5a8] sm:$0xf] }
  0x7f   :  { %1889 = vmatpush.bf16.msrb.mxu0 %v2984_v37  ;;  %v3084_v37 = vor.u32 %v3831_v24, %v3083_v22  ;;  %v3443_v22 = vld [vmem:[#allocation5 + $0x6e8] sm:$0xf]  ;;  %v2828_v25 = vor.u32 %v3764_v18, %v2825_v19  ;;  %v3854_v18 = vld [vmem:[#allocation5 + $0x4e4] sm:$0xf]  ;;  %v3185_v19 = vld [vmem:[#allocation5 + $0x4f4] sm:$0xf0] }
  0x80   :  { %1863 = vmatpush.bf16.msrb.mxu1 %v2664_v32  ;;  %v2883_v32 = vld [vmem:[#allocation5 + $0x288] sm:$0xf] }
  0x81   :  { %1900 = vmatpush.bf16.msrb.mxu2 %v3184_v31  ;;  %v3741_v31 = vld [vmem:[#allocation5 + $0x158] sm:$0xf0]  ;;  %v2884_v47 = vor.u32 %v3781_v33, %v2883_v32  ;;  %v2805_v32 = vld [vmem:[#allocation5 + $0x1fc] sm:$0xf0] }
  0x82   :  { %1876 = vmatpush.bf16.msrb.mxu3 %v2824_v36  ;;  %v3896_v36 = vld [vmem:[#allocation5 + $0x630] sm:$0xf0]  ;;  %v3263_v33 = vld [vmem:[#allocation5 + $0x580] sm:$0xf] }
  0x83   :  { %1890 = vmatpush.bf16.msrb.mxu0 %v2964_v50  ;;  %v3344_v48 = vor.u32 %v3896_v36, %v3343_v34  ;;  %v3774_v50 = vld [vmem:[#allocation5 + $0x264] sm:$0xf]  ;;  %v3876_v34 = vld [vmem:[#allocation5 + $0x590] sm:$0xf0]  ;;  %v3423_v36 = vld [vmem:[#allocation5 + $0x6c0] sm:$0xf] }
  0x84   :  { %1864 = vmatpush.bf16.msrb.mxu1 %v2644_v46  ;;  %v2724_v46 = vor.u32 %v3741_v31, %v2723_v29  ;;  %v2868_v62 = vor.u32 %v3774_v50, %v2865_v51  ;;  %v3759_v31 = vld [vmem:[#allocation5 + $0x1ec] sm:$0xf]  ;;  %v3264_v42 = vor.u32 %v3876_v34, %v3263_v33  ;;  %v3005_v34 = vld [vmem:[#allocation5 + $0x38c] sm:$0xf0] }
  0x85   :  { %1901 = vmatpush.bf16.msrb.mxu2 %v3164_v44  ;;  %v3941_v44 = vld [vmem:[#allocation5 + $0x798] sm:$0xf0]  ;;  %v3911_v50 = vld [vmem:[#allocation5 + $0x6a8] sm:$0xf0] }
  0x86   :  { %1877 = vmatpush.bf16.msrb.mxu3 %v2804_v49  ;;  %v3504_v49 = vor.u32 %v3936_v39, %v3503_v38  ;;  %v3524_v55 = vor.u32 %v3941_v44, %v3523_v43  ;;  %v2808_v39 = vor.u32 %v3759_v31, %v2805_v32  ;;  %v3754_v44 = vld [vmem:[#allocation5 + $0x1c4] sm:$0xf]  ;;  %v3505_v31 = vld [vmem:[#allocation5 + $0x774] sm:$0xf0]  ;;  %v3809_v32 = vld [vmem:[#allocation5 + $0x37c] sm:$0xf] }
  0x87   :  { %1891 = vmatpush.bf16.msrb.mxu0 %v2944_v0  ;;  %v2705_v0 = vld [vmem:[#allocation5 + $0x134] sm:$0xf0] }
  0x88   :  { %1865 = vmatpush.bf16.msrb.mxu1 %v2624_v59  ;;  %v3043_v59 = vld [vmem:[#allocation5 + $0x3c8] sm:$0xf] }
  0x89   :  { %1902 = vmatpush.bf16.msrb.mxu2 %v3144_v58  ;;  %v3931_v58 = vld [vmem:[#allocation5 + $0x748] sm:$0xf0]  ;;  %v3044_v8 = vor.u32 %v3821_v61, %v3043_v59  ;;  %v2765_v59 = vld [vmem:[#allocation5 + $0x1ac] sm:$0xf0] }
  0x8a   :  { %1878 = vmatpush.bf16.msrb.mxu3 %v2784_v63  ;;  %v3734_v63 = vld [vmem:[#allocation5 + $0x124] sm:$0xf]  ;;  %v3484_v2 = vor.u32 %v3931_v58, %v3483_v57  ;;  %v3749_v58 = vld [vmem:[#allocation5 + $0x19c] sm:$0xf]  ;;  %v3223_v61 = vld [vmem:[#allocation5 + $0x530] sm:$0xf] }
  0x8b   :  { %1892 = vmatpush.bf16.msrb.mxu0 %v2924_v14  ;;  %v2708_v12 = vor.u32 %v3734_v63, %v2705_v0  ;;  %v3729_v14 = vld [vmem:[#allocation5 + $0xfc] sm:$0xf]  ;;  %v3383_v63 = vld [vmem:[#allocation5 + $0x670] sm:$0xf]  ;;  %v3906_v0 = vld [vmem:[#allocation5 + $0x680] sm:$0xf0] }
  0x8c   :  { %1866 = vmatpush.bf16.msrb.mxu1 %v2604_v10  ;;  %3534 = vmatmul.msk.bf16.vlgmr.msra.gmra.mxu2 %vm1675_vm0, %v4184_v45  ;;  %v3463_v10 = vld [vmem:[#allocation5 + $0x710] sm:$0xf]  ;;  %v2688_v24 = vor.u32 %v3729_v14, %v2685_v15  ;;  %v3901_v14 = vld [vmem:[#allocation5 + $0x658] sm:$0xf0]  ;;  %v3814_v15 = vld [vmem:[#allocation5 + $0x3a4] sm:$0xf] }
  0x8d   :  { %1903 = vmatpush.bf16.msrb.mxu2 %v3124_v9  ;;  %v3886_v9 = vld [vmem:[#allocation5 + $0x5e0] sm:$0xf0]  ;;  %v3464_v17 = vor.u32 %v3926_v11, %v3463_v10  ;;  %v2745_v10 = vld [vmem:[#allocation5 + $0x184] sm:$0xf0] }
  0x8e   :  { %1879 = vmatpush.bf16.msrb.mxu3 %v2764_v13  ;;  %v2848_v13 = vor.u32 %v3769_v4, %v2845_v5  ;;  %v3304_v16 = vor.u32 %v3886_v9, %v3303_v6  ;;  %v3709_v4 = vld [vmem:[#allocation5 + $0x5c] sm:$0xf]  ;;  %v2605_v5 = vld [vmem:[#allocation5 + $0x6c] sm:$0xf0]  ;;  %v3744_v6 = vld [vmem:[#allocation5 + $0x174] sm:$0xf]  ;;  %v3384_v9 = vor.u32 %v3906_v0, %v3383_v63 }
  0x8f   :  { %1893 = vmatpush.bf16.msrb.mxu0 %v2904_v28  ;;  %v3203_v11 = vld [vmem:[#allocation5 + $0x508] sm:$0xf]  ;;  %v3799_v0 = vld [vmem:[#allocation5 + $0x32c] sm:$0xf] }
  0x90   :  { %1867 = vmatpush.bf16.msrb.mxu1 %v2584_v23  ;;  %v3921_v23 = vld [vmem:[#allocation5 + $0x6f8] sm:$0xf0]  ;;  %v3465_v63 = vld [vmem:[#allocation5 + $0x724] sm:$0xf0] }
  0x91   :  { %1904 = vmatpush.bf16.msrb.mxu2 %v3104_v21  ;;  %v3881_v21 = vld [vmem:[#allocation5 + $0x5b8] sm:$0xf0]  ;;  %v3444_v29 = vor.u32 %v3921_v23, %v3443_v22  ;;  %v2585_v22 = vld [vmem:[#allocation5 + $0x44] sm:$0xf0] }
  0x92   :  { %1880 = vmatpush.bf16.msrb.mxu3 %v2744_v27  ;;  %v2665_v27 = vld [vmem:[#allocation5 + $0xe4] sm:$0xf0]  ;;  %v3284_v28 = vor.u32 %v3881_v21, %v3283_v20  ;;  %v2748_v20 = vor.u32 %v3744_v6, %v2745_v10  ;;  %v3704_v21 = vld [vmem:[#allocation5 + $0x34] sm:$0xf] }
  0x93   :  { %1894 = vmatpush.bf16.msrb.mxu0 %v2884_v47  ;;  %v2668_v38 = vor.u32 %v3724_v26, %v2665_v27  ;;  %v3243_v47 = vld [vmem:[#allocation5 + $0x558] sm:$0xf]  ;;  %v2725_v26 = vld [vmem:[#allocation5 + $0x15c] sm:$0xf0]  ;;  %v2588_v33 = vor.u32 %v3704_v21, %v2585_v22  ;;  %v3879_v21 = vld [vmem:[#allocation5 + $0x5ac] sm:$0xf] }
  0x94   :  { %1868 = vmatpush.bf16.msrb.mxu1 %v2564_v41  ;;  %v2645_v41 = vld [vmem:[#allocation5 + $0xbc] sm:$0xf0] }
  0x95   :  { %1905 = vmatpush.bf16.msrb.mxu2 %v3084_v37  ;;  %v3916_v37 = vld [vmem:[#allocation5 + $0x6d0] sm:$0xf0]  ;;  %v2648_v51 = vor.u32 %v3719_v40, %v2645_v41  ;;  %v2565_v40 = vld [vmem:[#allocation5 + $0x1c] sm:$0xf0] }
  0x96   :  { %1881 = vmatpush.bf16.msrb.mxu3 %v2724_v46  ;;  %1895 = vmatmul.bf16.vlgmr.msrb.gmra.mxu0 %v4172_v53  ;;  %v3424_v43 = vor.u32 %v3916_v37, %v3423_v36  ;;  %v2785_v46 = vld [vmem:[#allocation5 + $0x1d4] sm:$0xf0]  ;;  %v3849_v36 = vld [vmem:[#allocation5 + $0x4bc] sm:$0xf]  ;;  %v3165_v37 = vld [vmem:[#allocation5 + $0x4cc] sm:$0xf0] }
  0x97   :  { %1946 = vmatpush.bf16.msra.mxu0 %v3524_v55  ;;  %1869 = vmatmul.bf16.vlgmr.msrb.gmra.mxu1 %v4174_v60  ;;  %v2788_v52 = vor.u32 %v3754_v44, %v2785_v46  ;;  %v2625_v55 = vld [vmem:[#allocation5 + $0x94] sm:$0xf0]  ;;  %v3008_v44 = vor.u32 %v3809_v32, %v3005_v34  ;;  %v3168_v46 = vor.u32 %v3849_v36, %v3165_v37  ;;  %v3285_v22 = vld [vmem:[#allocation5 + $0x5bc] sm:$0xf0]  ;;  %v3874_v36 = vld [vmem:[#allocation5 + $0x584] sm:$0xf] }
  0x98   :  { %1913 = vmatpush.bf16.msra.mxu1 %v3344_v48  ;;  %v3871_v48 = vld [vmem:[#allocation5 + $0x568] sm:$0xf0]  ;;  %v3265_v37 = vld [vmem:[#allocation5 + $0x594] sm:$0xf0] }
  0x99   :  { %1906 = vmatpush.bf16.msrb.mxu2 %v3064_v54  ;;  %1882 = vmatmul.bf16.vlgmr.msrb.gmra.mxu3 %v4181_v7  ;;  %v3714_v54 = vld [vmem:[#allocation5 + $0x84] sm:$0xf]  ;;  %v3244_v56 = vor.u32 %v3871_v48, %v3243_v47  ;;  %v3929_v47 = vld [vmem:[#allocation5 + $0x73c] sm:$0xf]  ;;  %v3485_v48 = vld [vmem:[#allocation5 + $0x74c] sm:$0xf0] }
  0x9a   :  { %1926 = vmatpush.bf16.msra.mxu3 %v3504_v49  ;;  %v3403_v49 = vld [vmem:[#allocation5 + $0x698] sm:$0xf] }
  0x9b   :  { %1965 = vmatpush.bf16.msrb.mxu0 %v2868_v62  ;;  %v3404_v57 = vor.u32 %v3911_v50, %v3403_v49  ;;  %v3866_v62 = vld [vmem:[#allocation5 + $0x540] sm:$0xf0]  ;;  %v3804_v49 = vld [vmem:[#allocation5 + $0x354] sm:$0xf] }
  0x9c   :  { %1914 = vmatpush.bf16.msra.mxu1 %v3324_v1  ;;  %v2628_v1 = vor.u32 %v3714_v54, %v2625_v55  ;;  %v3145_v54 = vld [vmem:[#allocation5 + $0x4a4] sm:$0xf0] }
  0x9d   :  { %1907 = vmatpush.bf16.msrb.mxu2 %v3044_v8  ;;  %v3224_v8 = vor.u32 %v3866_v62, %v3223_v61  ;;  %v3924_v62 = vld [vmem:[#allocation5 + $0x714] sm:$0xf] }
  0x9e   :  { %1927 = vmatpush.bf16.msra.mxu3 %v3484_v2  ;;  %v2768_v2 = vor.u32 %v3749_v58, %v2765_v59  ;;  %v3325_v58 = vld [vmem:[#allocation5 + $0x60c] sm:$0xf0]  ;;  %v3468_v6 = vor.u32 %v3924_v62, %v3465_v63  ;;  %v3819_v62 = vld [vmem:[#allocation5 + $0x3cc] sm:$0xf]  ;;  %v3045_v63 = vld [vmem:[#allocation5 + $0x3dc] sm:$0xf0] }
  0x9f   :  { %1966 = vmatpush.bf16.msrb.mxu0 %v2848_v13  ;;  %v3363_v13 = vld [vmem:[#allocation5 + $0x648] sm:$0xf] }
  0xa0   :  { %1915 = vmatpush.bf16.msra.mxu1 %v3304_v16  ;;  %1908 = vmatmul.bf16.vlgmr.msrb.gmra.mxu2 %v4176_v3  ;;  %v2608_v16 = vor.u32 %v3709_v4, %v2605_v5  ;;  %v3125_v4 = vld [vmem:[#allocation5 + $0x47c] sm:$0xf0] }
  0xa1   :  { %1952 = vmatpush.bf16.msra.mxu2 %v2708_v12  ;;  %v3861_v12 = vld [vmem:[#allocation5 + $0x518] sm:$0xf0] }
  0xa2   :  { %1928 = vmatpush.bf16.msra.mxu3 %v3464_v17  ;;  %v3025_v17 = vld [vmem:[#allocation5 + $0x3b4] sm:$0xf0]  ;;  %v3204_v23 = vor.u32 %v3861_v12, %v3203_v11  ;;  %v3919_v12 = vld [vmem:[#allocation5 + $0x6ec] sm:$0xf] }
  0xa3   :  { %1967 = vmatpush.bf16.msrb.mxu0 %v2828_v25  ;;  %v3739_v25 = vld [vmem:[#allocation5 + $0x14c] sm:$0xf]  ;;  %v3028_v27 = vor.u32 %v3814_v15, %v3025_v17  ;;  %v2945_v15 = vld [vmem:[#allocation5 + $0x314] sm:$0xf0] }
  0xa4   :  { %1916 = vmatpush.bf16.msra.mxu1 %v3284_v28  ;;  %v3188_v28 = vor.u32 %v3854_v18, %v3185_v19  ;;  %v3105_v17 = vld [vmem:[#allocation5 + $0x454] sm:$0xf0] }
  0xa5   :  { %1953 = vmatpush.bf16.msra.mxu2 %v2688_v24  ;;  %v3364_v24 = vor.u32 %v3901_v14, %v3363_v13  ;;  %v3445_v13 = vld [vmem:[#allocation5 + $0x6fc] sm:$0xf0]  ;;  %v3794_v14 = vld [vmem:[#allocation5 + $0x304] sm:$0xf] }
  0xa6   :  { %1929 = vmatpush.bf16.msra.mxu3 %v3444_v29  ;;  %3535 = vmatmul.msk.bf16.vlgmr.msra.gmra.mxu0 %vm1675_vm0, %v4184_v45  ;;  %v3934_v29 = vld [vmem:[#allocation5 + $0x764] sm:$0xf] }
  0xa7   :  { %1968 = vmatpush.bf16.msrb.mxu0 %v2808_v39  ;;  %v3699_v39 = vld [vmem:[#allocation5 + $0xc] sm:$0xf]  ;;  %v3508_v41 = vor.u32 %v3934_v29, %v3505_v31  ;;  %v3829_v29 = vld [vmem:[#allocation5 + $0x41c] sm:$0xf]  ;;  %v3085_v31 = vld [vmem:[#allocation5 + $0x42c] sm:$0xf0] }
  0xa8   :  { %1917 = vmatpush.bf16.msra.mxu1 %v3264_v42  ;;  %v3894_v42 = vld [vmem:[#allocation5 + $0x624] sm:$0xf]  ;;  %v2568_v50 = vor.u32 %v3699_v39, %v2565_v40  ;;  %v3088_v39 = vor.u32 %v3829_v29, %v3085_v31  ;;  %v3205_v29 = vld [vmem:[#allocation5 + $0x51c] sm:$0xf0] }
  0xa9   :  { %1954 = vmatpush.bf16.msra.mxu2 %v2668_v38  ;;  %v2728_v38 = vor.u32 %v3739_v25, %v2725_v26  ;;  %v3914_v25 = vld [vmem:[#allocation5 + $0x6c4] sm:$0xf]  ;;  %v3425_v26 = vld [vmem:[#allocation5 + $0x6d4] sm:$0xf0] }
  0xaa   :  { %1930 = vmatpush.bf16.msra.mxu3 %v3424_v43  ;;  %v3345_v43 = vld [vmem:[#allocation5 + $0x634] sm:$0xf0]  ;;  %v3428_v34 = vor.u32 %v3914_v25, %v3425_v26  ;;  %v2691_v25 = vld [vmem:[#allocation5 + $0x100] sm:$0xf] }
  0xab   :  { %1969 = vmatpush.bf16.msrb.mxu0 %v2788_v52  ;;  %v3844_v52 = vld [vmem:[#allocation5 + $0x494] sm:$0xf]  ;;  %v3348_v55 = vor.u32 %v3894_v42, %v3345_v43  ;;  %v3405_v42 = vld [vmem:[#allocation5 + $0x6ac] sm:$0xf0] }
  0xac   :  { %1918 = vmatpush.bf16.msra.mxu1 %v3244_v56  ;;  %v3488_v56 = vor.u32 %v3929_v47, %v3485_v48  ;;  %v3148_v61 = vor.u32 %v3844_v52, %v3145_v54  ;;  %v3784_v43 = vld [vmem:[#allocation5 + $0x2b4] sm:$0xf]  ;;  %v3065_v48 = vld [vmem:[#allocation5 + $0x404] sm:$0xf0]  ;;  %v3869_v52 = vld [vmem:[#allocation5 + $0x55c] sm:$0xf] }
  0xad   :  { %1955 = vmatpush.bf16.msra.mxu2 %v2648_v51  ;;  %v2985_v51 = vld [vmem:[#allocation5 + $0x364] sm:$0xf0]  ;;  %v3824_v47 = vld [vmem:[#allocation5 + $0x3f4] sm:$0xf]  ;;  %v3245_v54 = vld [vmem:[#allocation5 + $0x56c] sm:$0xf0] }
  0xae   :  { %1931 = vmatpush.bf16.msra.mxu3 %v3404_v57  ;;  %v3889_v57 = vld [vmem:[#allocation5 + $0x5fc] sm:$0xf]  ;;  %v2988_v59 = vor.u32 %v3804_v49, %v2985_v51 }
  0xaf   :  { %1970 = vmatpush.bf16.msrb.mxu0 %v2768_v2  ;;  %v3839_v2 = vld [vmem:[#allocation5 + $0x46c] sm:$0xf]  ;;  %v3328_v5 = vor.u32 %v3889_v57, %v3325_v58  ;;  %v3068_v57 = vor.u32 %v3824_v47, %v3065_v48  ;;  %v3385_v58 = vld [vmem:[#allocation5 + $0x684] sm:$0xf0] }
  0xb0   :  { %1919 = vmatpush.bf16.msra.mxu1 %v3224_v8  ;;  %v3884_v8 = vld [vmem:[#allocation5 + $0x5d4] sm:$0xf]  ;;  %v3128_v11 = vor.u32 %v3839_v2, %v3125_v4  ;;  %v3248_v2 = vor.u32 %v3869_v52, %v3245_v54  ;;  %v3737_v4 = vld [vmem:[#allocation5 + $0x138] sm:$0xf0]  ;;  %v3727_v47 = vld [vmem:[#allocation5 + $0xe8] sm:$0xf0] }
  0xb1   :  { %1956 = vmatpush.bf16.msra.mxu2 %v2628_v1  ;;  %v2965_v1 = vld [vmem:[#allocation5 + $0x33c] sm:$0xf0]  ;;  %v3812_v54 = vld [vmem:[#allocation5 + $0x390] sm:$0xf0] }
  0xb2   :  { %1932 = vmatpush.bf16.msra.mxu3 %v3384_v9  ;;  %v3305_v9 = vld [vmem:[#allocation5 + $0x5e4] sm:$0xf0]  ;;  %v2968_v10 = vor.u32 %v3799_v0, %v2965_v1  ;;  %v3011_v52 = vld [vmem:[#allocation5 + $0x380] sm:$0xf] }
  0xb3   :  { %1971 = vmatpush.bf16.msrb.mxu0 %v2748_v20  ;;  %v4212_v18 = vpop.f32.mrf.mxu0  ;;  %v3308_v19 = vor.u32 %v3884_v8, %v3305_v9  ;;  %v3448_v20 = vor.u32 %v3919_v12, %v3445_v13  ;;  %v2711_v0 = vld [vmem:[#allocation5 + $0x128] sm:$0xf]  ;;  %v3864_v9 = vld [vmem:[#allocation5 + $0x534] sm:$0xf]  ;;  %v3048_v12 = vor.u32 %v3819_v62, %v3045_v63  ;;  %v3722_v62 = vld [vmem:[#allocation5 + $0xc0] sm:$0xf0]  ;;  %v3012_v63 = vor.u32 %v3812_v54, %v3011_v52 }
  0xb4   :  { %1920 = vmatpush.bf16.msra.mxu1 %v3204_v23  ;;  %v2948_v23 = vor.u32 %v3794_v14, %v2945_v15  ;;  %v4214_v32 = vpop.f32.mrf.mxu1  ;;  %v3899_v14 = vld [vmem:[#allocation5 + $0x64c] sm:$0xf]  ;;  %v3365_v15 = vld [vmem:[#allocation5 + $0x65c] sm:$0xf0]  ;;  %v2751_v54 = vld [vmem:[#allocation5 + $0x178] sm:$0xf] }
  0xb5   :  { %1957 = vmatpush.bf16.msra.mxu2 %v2608_v16  ;;  %v3834_v16 = vld [vmem:[#allocation5 + $0x444] sm:$0xf]  ;;  %v3368_v26 = vor.u32 %v3899_v14, %v3365_v15  ;;  %v3717_v14 = vld [vmem:[#allocation5 + $0x98] sm:$0xf0] }
  0xb6   :  { %1933 = vmatpush.bf16.msra.mxu3 %v3364_v24  ;;  %v3108_v24 = vor.u32 %v3834_v16, %v3105_v17  ;;  %v2871_v16 = vld [vmem:[#allocation5 + $0x268] sm:$0xf] }
  0xb7   :  { %1972 = vmatpush.bf16.msrb.mxu0 %v2728_v38  ;;  %1921 = vmatmul.bf16.vlgmr.msra.gmra.mxu1 %v4188_v30 }
  0xb8   :  { %1978 = vmatpush.bf16.msrb.mxu1 %v3028_v27  ;;  %v3789_v27 = vld [vmem:[#allocation5 + $0x2dc] sm:$0xf] }
  0xb9   :  { %1958 = vmatpush.bf16.msra.mxu2 %v2588_v33  ;;  %1934 = vmatmul.bf16.vlgmr.msra.gmra.mxu3 %v4190_v35  ;;  %v3288_v33 = vor.u32 %v3879_v21, %v3285_v22  ;;  %v3777_v21 = vld [vmem:[#allocation5 + $0x278] sm:$0xf0]  ;;  %v3191_v22 = vld [vmem:[#allocation5 + $0x4e8] sm:$0xf] }
  0xba   :  { %1991 = vmatpush.bf16.msrb.mxu3 %v3188_v28  ;;  %1973 = vmatmul.bf16.vlgmr.msrb.gmra.mxu0 %v4181_v7  ;;  %v2925_v28 = vld [vmem:[#allocation5 + $0x2ec] sm:$0xf0]  ;;  %v2872_v31 = vor.u32 %v3777_v21, %v2871_v16  ;;  %v3802_v21 = vld [vmem:[#allocation5 + $0x340] sm:$0xf0] }
  0xbb   :  { %2017 = vmatpush.bf16.msra.mxu0 %v3508_v41  ;;  %v2928_v38 = vor.u32 %v3789_v27, %v2925_v28  ;;  %v4216_v40 = vpop.f32.mrf.mxu2  ;;  %v3909_v41 = vld [vmem:[#allocation5 + $0x69c] sm:$0xf]  ;;  %v1690_v49 = vpop.f32.mrf.mxu0  ;;  %v3732_v27 = vld [vmem:[#allocation5 + $0x110] sm:$0xf0]  ;;  %v3859_v28 = vld [vmem:[#allocation5 + $0x50c] sm:$0xf] }
  0xbc   :  { %1979 = vmatpush.bf16.msrb.mxu1 %v3008_v44  ;;  %v4218_v44 = vpop.f32.mrf.mxu3  ;;  %v3408_v51 = vor.u32 %v3909_v41, %v3405_v42  ;;  %v1703_v1 = vpop.f32.mrf.mxu1  ;;  %v3852_v41 = vld [vmem:[#allocation5 + $0x4d0] sm:$0xf0]  ;;  %v2692_v42 = vor.u32 %v3732_v27, %v2691_v25  ;;  %v3837_v25 = vld [vmem:[#allocation5 + $0x458] sm:$0xf0]  ;;  %v2611_v27 = vld [vmem:[#allocation5 + $0x60] sm:$0xf] }
  0xbd   :  { %1959 = vmatpush.bf16.msra.mxu2 %v2568_v50  ;;  %v3268_v50 = vor.u32 %v3874_v36, %v3265_v37  ;;  %v3031_v36 = vld [vmem:[#allocation5 + $0x3a8] sm:$0xf]  ;;  %v3817_v37 = vld [vmem:[#allocation5 + $0x3b8] sm:$0xf0] }
  0xbe   :  { %1992 = vmatpush.bf16.msrb.mxu3 %v3168_v46  ;;  %v2905_v46 = vld [vmem:[#allocation5 + $0x2c4] sm:$0xf0]  ;;  %v3032_v48 = vor.u32 %v3817_v37, %v3031_v36  ;;  %v3797_v37 = vld [vmem:[#allocation5 + $0x318] sm:$0xf0] }
  0xbf   :  { %2018 = vmatpush.bf16.msra.mxu0 %v3488_v56  ;;  %v2908_v56 = vor.u32 %v3784_v43, %v2905_v46  ;;  %v3208_v43 = vor.u32 %v3859_v28, %v3205_v29  ;;  %v2671_v46 = vld [vmem:[#allocation5 + $0xd8] sm:$0xf]  ;;  %v3712_v28 = vld [vmem:[#allocation5 + $0x70] sm:$0xf0]  ;;  %v2951_v36 = vld [vmem:[#allocation5 + $0x308] sm:$0xf] }
  0xc0   :  { %1980 = vmatpush.bf16.msrb.mxu1 %v2988_v59  ;;  %1960 = vmatmul.bf16.vlgmr.msra.gmra.mxu2 %v4174_v60  ;;  %v3779_v59 = vld [vmem:[#allocation5 + $0x28c] sm:$0xf] }
  0xc1   :  { %2004 = vmatpush.bf16.msrb.mxu2 %v3348_v55  ;;  %v3904_v55 = vld [vmem:[#allocation5 + $0x674] sm:$0xf] }
  0xc2   :  { %1993 = vmatpush.bf16.msrb.mxu3 %v3148_v61  ;;  %v2885_v61 = vld [vmem:[#allocation5 + $0x29c] sm:$0xf0]  ;;  %v3388_v8 = vor.u32 %v3904_v55, %v3385_v58  ;;  %v3847_v58 = vld [vmem:[#allocation5 + $0x4a8] sm:$0xf0] }
  0xc3   :  { %2019 = vmatpush.bf16.msra.mxu0 %v3468_v6  ;;  %v3525_v6 = vld [vmem:[#allocation5 + $0x79c] sm:$0xf0]  ;;  %v1716_v13 = vpop.f32.mrf.mxu2 }
  0xc4   :  { %1981 = vmatpush.bf16.msrb.mxu1 %v2968_v10  ;;  %v3225_v10 = vld [vmem:[#allocation5 + $0x544] sm:$0xf0]  ;;  %v1729_v17 = vpop.f32.mrf.mxu3 }
  0xc5   :  { %2005 = vmatpush.bf16.msrb.mxu2 %v3328_v5  ;;  %v3939_v5 = vld [vmem:[#allocation5 + $0x78c] sm:$0xf]  ;;  %v2631_v13 = vld [vmem:[#allocation5 + $0x88] sm:$0xf] }
  0xc6   :  { %1994 = vmatpush.bf16.msrb.mxu3 %v3128_v11  ;;  %v2888_v11 = vor.u32 %v3779_v59, %v2885_v61  ;;  %v2672_v59 = vor.u32 %v3727_v47, %v2671_v46  ;;  %v2651_v61 = vld [vmem:[#allocation5 + $0xb0] sm:$0xf]  ;;  %v2591_v47 = vld [vmem:[#allocation5 + $0x38] sm:$0xf] }
  0xc7   :  { %2020 = vmatpush.bf16.msra.mxu0 %v3448_v20  ;;  %v3528_v20 = vor.u32 %v3939_v5, %v3525_v6  ;;  %v3807_v5 = vld [vmem:[#allocation5 + $0x368] sm:$0xf0]  ;;  %v3762_v6 = vld [vmem:[#allocation5 + $0x200] sm:$0xf0] }
  0xc8   :  { %1982 = vmatpush.bf16.msrb.mxu1 %v2948_v23  ;;  %v3857_v23 = vld [vmem:[#allocation5 + $0x4f8] sm:$0xf0] }
  0xc9   :  { %2006 = vmatpush.bf16.msrb.mxu2 %v3308_v19  ;;  %v2712_v19 = vor.u32 %v3737_v4, %v2711_v0  ;;  %v2991_v4 = vld [vmem:[#allocation5 + $0x358] sm:$0xf] }
  0xca   :  { %1995 = vmatpush.bf16.msrb.mxu3 %v3108_v24  ;;  %v3228_v24 = vor.u32 %v3864_v9, %v3225_v10  ;;  %v3842_v9 = vld [vmem:[#allocation5 + $0x480] sm:$0xf0]  ;;  %v2992_v15 = vor.u32 %v3807_v5, %v2991_v4  ;;  %v3351_v5 = vld [vmem:[#allocation5 + $0x628] sm:$0xf] }
  0xcb   :  { %2021 = vmatpush.bf16.msra.mxu0 %v3428_v34  ;;  %v2851_v34 = vld [vmem:[#allocation5 + $0x240] sm:$0xf]  ;;  %v4221_v55 = vpop.f32.mrf.mxu2 }
  0xcc   :  { %1983 = vmatpush.bf16.msrb.mxu1 %v2928_v38  ;;  %v3772_v38 = vld [vmem:[#allocation5 + $0x250] sm:$0xf0] }
  0xcd   :  { %2007 = vmatpush.bf16.msrb.mxu2 %v3288_v33  ;;  %v3192_v33 = vor.u32 %v3857_v23, %v3191_v22  ;;  %v2852_v49 = vor.u32 %v3772_v38, %v2851_v34  ;;  %v3757_v23 = vld [vmem:[#allocation5 + $0x1d8] sm:$0xf0]  ;;  %v2771_v34 = vld [vmem:[#allocation5 + $0x1a0] sm:$0xf]  ;;  %v3752_v38 = vld [vmem:[#allocation5 + $0x1b0] sm:$0xf0] }
  0xce   :  { %1996 = vmatpush.bf16.msrb.mxu3 %v3088_v39  ;;  %v3171_v39 = vld [vmem:[#allocation5 + $0x4c0] sm:$0xf] }
  0xcf   :  { %2022 = vmatpush.bf16.msra.mxu0 %v3408_v51  ;;  %v2831_v51 = vld [vmem:[#allocation5 + $0x218] sm:$0xf] }
  0xd0   :  { %1984 = vmatpush.bf16.msrb.mxu1 %v2908_v56  ;;  %v3767_v56 = vld [vmem:[#allocation5 + $0x228] sm:$0xf0] }
  0xd1   :  { %2008 = vmatpush.bf16.msrb.mxu2 %v3268_v50  ;;  %v3172_v50 = vor.u32 %v3852_v41, %v3171_v39  ;;  %v2832_v0 = vor.u32 %v3767_v56, %v2831_v51  ;;  %v3091_v39 = vld [vmem:[#allocation5 + $0x420] sm:$0xf]  ;;  %v3832_v41 = vld [vmem:[#allocation5 + $0x430] sm:$0xf0]  ;;  %v2772_v51 = vor.u32 %v3752_v38, %v2771_v34  ;;  %v3531_v38 = vld [vmem:[#allocation5 + $0x790] sm:$0xf] }
  0xd2   :  { %1997 = vmatpush.bf16.msrb.mxu3 %v3068_v57  ;;  %v3151_v57 = vld [vmem:[#allocation5 + $0x498] sm:$0xf]  ;;  %v3092_v52 = vor.u32 %v3832_v41, %v3091_v39  ;;  %v2931_v56 = vld [vmem:[#allocation5 + $0x2e0] sm:$0xf]  ;;  %v3942_v39 = vld [vmem:[#allocation5 + $0x7a0] sm:$0xf0] }
  0xd3   :  { %2023 = vmatpush.bf16.msra.mxu0 %v3388_v8  ;;  %v3152_v1 = vor.u32 %v3847_v58, %v3151_v57  ;;  %v3131_v8 = vld [vmem:[#allocation5 + $0x470] sm:$0xf]  ;;  %v4226_v10 = vpop.f32.mrf.mxu0  ;;  %v1768_v22 = vpop.f32.mrf.mxu2  ;;  %v3792_v57 = vld [vmem:[#allocation5 + $0x2f0] sm:$0xf0]  ;;  %v3491_v41 = vld [vmem:[#allocation5 + $0x740] sm:$0xf] }
  0xd4   :  { %1985 = vmatpush.bf16.msrb.mxu1 %v2888_v11  ;;  %v2652_v11 = vor.u32 %v3722_v62, %v2651_v61  ;;  %v3132_v17 = vor.u32 %v3842_v9, %v3131_v8  ;;  %v3071_v61 = vld [vmem:[#allocation5 + $0x3f8] sm:$0xf]  ;;  %v3827_v62 = vld [vmem:[#allocation5 + $0x408] sm:$0xf0]  ;;  %v2932_v4 = vor.u32 %v3792_v57, %v2931_v56 }
  0xd5   :  { %2009 = vmatpush.bf16.msrb.mxu2 %v3248_v2  ;;  %v2811_v2 = vld [vmem:[#allocation5 + $0x1f0] sm:$0xf]  ;;  %v3072_v9 = vor.u32 %v3827_v62, %v3071_v61  ;;  %v3471_v56 = vld [vmem:[#allocation5 + $0x718] sm:$0xf]  ;;  %v3927_v57 = vld [vmem:[#allocation5 + $0x728] sm:$0xf0] }
  0xd6   :  { %1998 = vmatpush.bf16.msrb.mxu3 %v3048_v12  ;;  %v4228_v12 = vpop.f32.mrf.mxu1  ;;  %v2812_v16 = vor.u32 %v3762_v6, %v2811_v2  ;;  %v3702_v2 = vld [vmem:[#allocation5 + $0x20] sm:$0xf0]  ;;  %v3897_v6 = vld [vmem:[#allocation5 + $0x638] sm:$0xf0] }
  0xd7   :  { %1986 = vmatmul.bf16.vlgmr.msrb.gmra.mxu1 %v4172_v53  ;;  %2024 = vmatpush.bf16.msra.mxu0 %v3368_v26  ;;  %v2632_v26 = vor.u32 %v3717_v14, %v2631_v13  ;;  %v2911_v13 = vld [vmem:[#allocation5 + $0x2b8] sm:$0xf]  ;;  %v3787_v14 = vld [vmem:[#allocation5 + $0x2c8] sm:$0xf0] }
  0xd8   :  { %2037 = vmatpush.bf16.msra.mxu1 %v3528_v20  ;;  %v2971_v20 = vld [vmem:[#allocation5 + $0x330] sm:$0xf]  ;;  %v3958_v61 = vld [vmem:[#allocation8 + $0x78] sm:$0xff] }
  0xd9   :  { %2010 = vmatpush.bf16.msrb.mxu2 %v3228_v24  ;;  %1999 = vmatmul.bf16.vlgmr.msrb.gmra.mxu3 %v4176_v3  ;;  %v3111_v24 = vld [vmem:[#allocation5 + $0x448] sm:$0xf]  ;;  %v2972_v29 = vor.u32 %v3802_v21, %v2971_v20  ;;  %v3937_v21 = vld [vmem:[#allocation5 + $0x778] sm:$0xf0] }
  0xda   :  { %2043 = vmatpush.bf16.msra.mxu3 %v2712_v19  ;;  %2025 = vmatmul.bf16.vlgmr.msra.gmra.mxu0 %v4190_v35  ;;  %v2791_v19 = vld [vmem:[#allocation5 + $0x1c8] sm:$0xf] }
  0xdb   :  { %2082 = vmatpush.bf16.msrb.mxu0 %v3192_v33  ;;  %v3112_v33 = vor.u32 %v3837_v25, %v3111_v24  ;;  %v1742_v46 = vpop.f32.mrf.mxu0  ;;  %v3511_v20 = vld [vmem:[#allocation5 + $0x768] sm:$0xf]  ;;  %v3352_v24 = vor.u32 %v3897_v6, %v3351_v5  ;;  %v2912_v25 = vor.u32 %v3787_v14, %v2911_v13  ;;  %v3957_v6 = vld [vmem:[#allocation8 + $0x70] sm:$0xff]  ;;  %v3947_v14 = vld [vmem:[#allocation8 + $0x20] sm:$0xff] }
  0xdc   :  { %2056 = vmatpush.bf16.msrb.mxu1 %v2872_v31  ;;  %v2792_v31 = vor.u32 %v3757_v23, %v2791_v19 }
  0xdd   :  { %2011 = vmatpush.bf16.msrb.mxu2 %v3208_v43  ;;  %v4230_v43 = vpop.f32.mrf.mxu3 }
  0xde   :  { %2044 = vmatpush.bf16.msra.mxu3 %v2692_v42  ;;  %v2612_v42 = vor.u32 %v3712_v28, %v2611_v27 }
  0xdf   :  { %2083 = vmatpush.bf16.msrb.mxu0 %v3172_v50  ;;  %v1755_v50 = vpop.f32.mrf.mxu1  ;;  %v4234_v58 = vpop.f32.mrf.mxu2 }
  0xe0   :  { %2057 = vmatpush.bf16.msrb.mxu1 %v2852_v49  ;;  %2012 = vmatmul.bf16.vlgmr.msrb.gmra.mxu2 %v4188_v30  ;;  %v2952_v49 = vor.u32 %v3797_v37, %v2951_v36  ;;  %v3512_v36 = vor.u32 %v3937_v21, %v3511_v20  ;;  %v3950_v37 = vld [vmem:[#allocation8 + $0x38] sm:$0xff]  ;;  %v3251_v20 = vld [vmem:[#allocation5 + $0x560] sm:$0xf] }
  0xe1   :  { %2069 = vmatpush.bf16.msra.mxu2 %v3032_v48  ;;  %v3707_v48 = vld [vmem:[#allocation5 + $0x48] sm:$0xf0] }
  0xe2   :  { %2045 = vmatpush.bf16.msra.mxu3 %v2672_v59  ;;  %v3747_v59 = vld [vmem:[#allocation5 + $0x188] sm:$0xf0] }
  0xe3   :  { %2084 = vmatpush.bf16.msrb.mxu0 %v3152_v1  ;;  %v2571_v1 = vld [vmem:[#allocation5 + $0x10] sm:$0xf]  ;;  %v2752_v8 = vor.u32 %v3747_v59, %v2751_v54  ;;  %v3887_v50 = vld [vmem:[#allocation5 + $0x5e8] sm:$0xf0]  ;;  %v3949_v54 = vld [vmem:[#allocation8 + $0x30] sm:$0xff] }
  0xe4   :  { %2058 = vmatpush.bf16.msrb.mxu1 %v2832_v0  ;;  %v2592_v0 = vor.u32 %v3707_v48, %v2591_v47  ;;  %v2572_v19 = vor.u32 %v3702_v2, %v2571_v1  ;;  %v3472_v1 = vor.u32 %v3927_v57, %v3471_v56  ;;  %v3948_v2 = vld [vmem:[#allocation8 + $0x28] sm:$0xff]  ;;  %v3953_v56 = vld [vmem:[#allocation8 + $0x50] sm:$0xff] }
  0xe5   :  { %2070 = vmatpush.bf16.msra.mxu2 %v3012_v63  ;;  %v4236_v63 = vld [vmem:[#allocation7] sm:$0x1f]  ;;  %v1781_v22 = vpop.f32.mrf.mxu3 }
  0xe6   :  { %2046 = vmatpush.bf16.msra.mxu3 %v2652_v11  ;;  %v2731_v11 = vld [vmem:[#allocation5 + $0x150] sm:$0xf]  ;;  %v391_v23 = vperm.slane %v4236_v63, 0 }
  0xe7   :  { %2085 = vmatpush.bf16.msrb.mxu0 %v3132_v17  ;;  %3536 = vmatmul.msk.bf16.vlgmr.msra.gmra.mxu1 %vm1675_vm0, %v4184_v45  ;;  %v3822_v17 = vld [vmem:[#allocation5 + $0x3e0] sm:$0xf0]  ;;  %v1794_v34 = vpop.f32.mrf.mxu2 }
  0xe8   :  { %2059 = vmatpush.bf16.msrb.mxu1 %v2812_v16  ;;  %v3051_v16 = vld [vmem:[#allocation5 + $0x3d0] sm:$0xf]  ;;  %v1689_v48 = vadd.f32 %v4212_v18, %v391_v23  ;;  %v3946_v23 = vld [vmem:[#allocation8 + $0x18] sm:$0xff] }
  0xe9   :  { %2071 = vmatpush.bf16.msra.mxu2 %v2992_v15  ;;  %v3742_v15 = vld [vmem:[#allocation5 + $0x160] sm:$0xf0]  ;;  %v3052_v28 = vor.u32 %v3822_v17, %v3051_v16  ;;  %v3291_v18 = vld [vmem:[#allocation5 + $0x5b0] sm:$0xf] }
  0xea   :  { %2047 = vmatpush.bf16.msra.mxu3 %v2632_v26  ;;  %v3331_v26 = vld [vmem:[#allocation5 + $0x600] sm:$0xf]  ;;  %v2732_v27 = vor.u32 %v3742_v15, %v2731_v11  ;;  %v1702_v62 = vadd.f32 %v4214_v32, %v1689_v48  ;;  %v3917_v15 = vld [vmem:[#allocation5 + $0x6d8] sm:$0xf0] }
  0xeb   :  { %2086 = vmatpush.bf16.msrb.mxu0 %v3112_v33  ;;  %v3782_v33 = vld [vmem:[#allocation5 + $0x2a0] sm:$0xf0] }
  0xec   :  { %2060 = vmatpush.bf16.msrb.mxu1 %v2792_v31  ;;  %v2891_v31 = vld [vmem:[#allocation5 + $0x290] sm:$0xf]  ;;  %v1715_v32 = vadd.f32 %v4216_v40, %v1702_v62  ;;  %v3872_v40 = vld [vmem:[#allocation5 + $0x570] sm:$0xf0] }
  0xed   :  { %2072 = vmatpush.bf16.msra.mxu2 %v2972_v29  ;;  %v3892_v29 = vld [vmem:[#allocation5 + $0x610] sm:$0xf0]  ;;  %v2892_v47 = vor.u32 %v3782_v33, %v2891_v31  ;;  %v3231_v31 = vld [vmem:[#allocation5 + $0x538] sm:$0xf] }
  0xee   :  { %2048 = vmatpush.bf16.msra.mxu3 %v2612_v42  ;;  %v3932_v42 = vld [vmem:[#allocation5 + $0x750] sm:$0xf0]  ;;  %v3332_v46 = vor.u32 %v3892_v29, %v3331_v26  ;;  %v1728_v17 = vadd.f32 %v4218_v44, %v1715_v32  ;;  %v3867_v44 = vld [vmem:[#allocation5 + $0x548] sm:$0xf0] }
  0xef   :  { %2087 = vmatpush.bf16.msrb.mxu0 %v3092_v52  ;;  %v3492_v52 = vor.u32 %v3932_v42, %v3491_v41  ;;  %v3912_v26 = vld [vmem:[#allocation5 + $0x6b0] sm:$0xf0]  ;;  %v3232_v41 = vor.u32 %v3867_v44, %v3231_v31  ;;  %v3954_v42 = vld [vmem:[#allocation8 + $0x58] sm:$0xff] }
  0xf0   :  { %2061 = vmatpush.bf16.msrb.mxu1 %v2772_v51  ;;  %v3532_v51 = vor.u32 %v3942_v39, %v3531_v38  ;;  %v3955_v29 = vld [vmem:[#allocation8 + $0x60] sm:$0xff]  ;;  %v3972_v31 = vld [vmem:[#allocation8 + $0xe8] sm:$0xff] }
  0xf1   :  { %2073 = vmatpush.bf16.msra.mxu2 %v2952_v49  ;;  %v3311_v49 = vld [vmem:[#allocation5 + $0x5d8] sm:$0xf]  ;;  %v3907_v39 = vld [vmem:[#allocation5 + $0x688] sm:$0xf0] }
  0xf2   :  { %2049 = vmatpush.bf16.msra.mxu3 %v2592_v0  ;;  %v3312_v59 = vor.u32 %v3887_v50, %v3311_v49  ;;  %v3882_v0 = vld [vmem:[#allocation5 + $0x5c0] sm:$0xf0]  ;;  %v3944_v50 = vld [vmem:[#allocation8 + $0x8] sm:$0xff]  ;;  %v3971_v44 = vld [vmem:[#allocation8 + $0xe0] sm:$0xff] }
  0xf3   :  { %2088 = vmatpush.bf16.msrb.mxu0 %v3072_v9  ;;  %v3292_v5 = vor.u32 %v3882_v0, %v3291_v18  ;;  %v3877_v9 = vld [vmem:[#allocation5 + $0x598] sm:$0xf0]  ;;  %v1805_v11 = vpop.f32.mrf.mxu0  ;;  %v3943_v18 = vld [vmem:[#allocation8] sm:$0xff] }
  0xf4   :  { %2062 = vmatpush.bf16.msrb.mxu1 %v2752_v8  ;;  %v3271_v8 = vld [vmem:[#allocation5 + $0x588] sm:$0xf] }
  0xf5   :  { %2074 = vmatpush.bf16.msra.mxu2 %v2932_v4  ;;  %v3922_v4 = vld [vmem:[#allocation5 + $0x700] sm:$0xf0]  ;;  %v3272_v16 = vor.u32 %v3877_v9, %v3271_v8 }
  0xf6   :  { %2050 = vmatpush.bf16.msra.mxu3 %v2572_v19  ;;  %v1818_v19 = vpop.f32.mrf.mxu1 }
  0xf7   :  { %2089 = vmatpush.bf16.msrb.mxu0 %v3052_v28 }
  0xf8   :  { %2063 = vmatpush.bf16.msrb.mxu1 %v2732_v27  ;;  %v3252_v27 = vor.u32 %v3872_v40, %v3251_v20  ;;  %v3974_v20 = vld [vmem:[#allocation8 + $0xf8] sm:$0xff] }
  0xf9   :  { %2075 = vmatpush.bf16.msra.mxu2 %v2912_v25  ;;  %2051 = vmatmul.bf16.vlgmr.msra.gmra.mxu3 %v4174_v60  ;;  %v3451_v60 = vld [vmem:[#allocation5 + $0x6f0] sm:$0xf]  ;;  %v3411_v25 = vld [vmem:[#allocation5 + $0x6a0] sm:$0xf] }
  0xfa   :  { %2095 = vmatpush.bf16.msrb.mxu3 %v3352_v24  ;;  %2090 = vmatmul.bf16.vlgmr.msrb.gmra.mxu0 %v4176_v3  ;;  %v3452_v13 = vor.u32 %v3922_v4, %v3451_v60  ;;  %v3956_v3 = vld [vmem:[#allocation8 + $0x68] sm:$0xff]  ;;  %v1741_v24 = vadd.f32 %v4226_v10, %v1728_v17  ;;  %v3951_v4 = vld [vmem:[#allocation8 + $0x40] sm:$0xff] }
  0xfb   :  { %2468 = vmatpush.bf16.msra.mxu0 %v3950_v37  ;;  %2064 = vmatmul.bf16.vlgmr.msrb.gmra.mxu1 %v4181_v7  ;;  %v392_v7 = vperm.slane %v4236_v63, 1  ;;  %v1807_v33 = vpop.f32.mrf.mxu0  ;;  %v3391_v10 = vld [vmem:[#allocation5 + $0x678] sm:$0xf] }
  0xfc   :  { %2108 = vmatpush.bf16.msra.mxu1 %v3512_v36  ;;  %v1831_v28 = vpop.f32.mrf.mxu3  ;;  %v3945_v36 = vld [vmem:[#allocation8 + $0x10] sm:$0xff]  ;;  %v1754_v37 = vadd.f32 %v4228_v12, %v1741_v24  ;;  %v3371_v12 = vld [vmem:[#allocation5 + $0x650] sm:$0xf]  ;;  %v3960_v17 = vld [vmem:[#allocation8 + $0x88] sm:$0xff] }
  0xfd   :  { %2076 = vmatpush.bf16.msra.mxu2 %v2892_v47  ;;  %v1780_v21 = vadd.f32 %v4230_v43, %v392_v7  ;;  %v3412_v43 = vor.u32 %v3912_v26, %v3411_v25  ;;  %v3862_v47 = vld [vmem:[#allocation5 + $0x520] sm:$0xf0] }
  0xfe   :  { %2096 = vmatpush.bf16.msrb.mxu3 %v3332_v46  ;;  %v3211_v46 = vld [vmem:[#allocation5 + $0x510] sm:$0xf]  ;;  %v1820_v48 = vpop.f32.mrf.mxu1 }
  0xff   :  { %2469 = vmatpush.bf16.msra.mxu0 %v3949_v54  ;;  %v1793_v34 = vadd.f32 %v4234_v58, %v1780_v21  ;;  %v1844_v38 = vpop.f32.mrf.mxu2  ;;  %v3392_v58 = vor.u32 %v3907_v39, %v3391_v10  ;;  %v3212_v54 = vor.u32 %v3862_v47, %v3211_v46  ;;  %v3969_v39 = vld [vmem:[#allocation8 + $0xd0] sm:$0xff]  ;;  %v3968_v48 = vld [vmem:[#allocation8 + $0xc8] sm:$0xff] }
 0x100   :  { %2109 = vmatpush.bf16.msra.mxu1 %v3492_v52  ;;  %2077 = vmatmul.bf16.vlgmr.msra.gmra.mxu2 %v4172_v53  ;;  %v3431_v53 = vld [vmem:[#allocation5 + $0x6c8] sm:$0xf]  ;;  %v3902_v52 = vld [vmem:[#allocation5 + $0x660] sm:$0xf0] }
 0x101   :  { %2128 = vmatpush.bf16.msrb.mxu2 %v3532_v51  ;;  %v3432_v22 = vor.u32 %v3917_v15, %v3431_v53  ;;  %v1806_v49 = vadd.f32 %v1805_v11, %v1793_v34  ;;  %v1767_v51 = vadd.f32 %v4221_v55, %v1754_v37  ;;  %v3372_v62 = vor.u32 %v3902_v52, %v3371_v12  ;;  %v3952_v55 = vld [vmem:[#allocation8 + $0x48] sm:$0xff]  ;;  %v3963_v11 = vld [vmem:[#allocation8 + $0xa0] sm:$0xff]  ;;  %v3970_v37 = vld [vmem:[#allocation8 + $0xd8] sm:$0xff] }
 0x102   :  { %2097 = vmatpush.bf16.msrb.mxu3 %v3312_v59  ;;  %v3966_v59 = vld [vmem:[#allocation8 + $0xb8] sm:$0xff]  ;;  %v394_v52 = vperm.slane %v4236_v63, 3 }
 0x103   :  { %2470 = vmatpush.bf16.msra.mxu0 %v3948_v2  ;;  %v2134_v0 = vmax.f32 %v1767_v51, 0.0  ;;  %v3965_v2 = vld [vmem:[#allocation8 + $0xb0] sm:$0xff]  ;;  %v3967_v51 = vld [vmem:[#allocation8 + $0xc0] sm:$0xff] }
 0x104   :  { %2110 = vmatpush.bf16.msra.mxu1 %v3472_v1  ;;  %v1833_v57 = vpop.f32.mrf.mxu3 }
 0x105   :  { %2481 = vmatpush.bf16.msra.mxu2 %v3958_v61  ;;  %v1819_v61 = vadd.f32 %v1818_v19, %v1806_v49  ;;  %v2139_v60 = vpack.c.bf16 %v2134_v0, %v2134_v0  ;;  %v393_v19 = vperm.slane %v4236_v63, 2  ;;  %v3982_v0 = vld [vmem:[#allocation8 + $0x138] sm:$0xff] }
 0x106   :  { %2098 = vmatpush.bf16.msrb.mxu3 %v3292_v5 }
 0x107   :  { %2471 = vmatpush.bf16.msra.mxu0 %v3947_v14  ;;  %v1846_v1 = vpop.f32.mrf.mxu2 }
 0x108   :  { %2111 = vmatpush.bf16.msra.mxu1 %v3452_v13 }
 0x109   :  { %2482 = vmatpush.bf16.msra.mxu2 %v3957_v6  ;;  %v3964_v6 = vld [vmem:[#allocation8 + $0xa8] sm:$0xff] }
 0x10a   :  { %2099 = vmatpush.bf16.msrb.mxu3 %v3272_v16 }
 0x10b   :  { %2472 = vmatpush.bf16.msra.mxu0 %v3946_v23  ;;  %v3959_v23 = vld [vmem:[#allocation8 + $0x80] sm:$0xff] }
 0x10c   :  { %2112 = vmatpush.bf16.msra.mxu1 %v3432_v22  ;;  %v3973_v22 = vld [vmem:[#allocation8 + $0xf0] sm:$0xff] }
 0x10d   :  { %2483 = vmatpush.bf16.msra.mxu2 %v3956_v3 }
 0x10e   :  { %2100 = vmatpush.bf16.msrb.mxu3 %v3252_v27 }
 0x10f   :  { %2473 = vmatpush.bf16.msra.mxu0 %v3945_v36  ;;  %v1857_v32 = vpop.f32.mrf.mxu2 }
 0x110   :  { %2113 = vmatpush.bf16.msra.mxu1 %v3412_v43  ;;  %3537 = vmatmul.msk.bf16.vlgmr.msrb.gmra.mxu2 %vm1675_vm0, %v4184_v45  ;;  %v1832_v45 = vadd.f32 %v1831_v28, %v1819_v61 }
 0x111   :  { %2484 = vmatpush.bf16.msra.mxu2 %v3955_v29 }
 0x112   :  { %2101 = vmatpush.bf16.msrb.mxu3 %v3232_v41  ;;  %v1845_v5 = vadd.f32 %v1844_v38, %v1832_v45 }
 0x113   :  { %2474 = vmatpush.bf16.msra.mxu0 %v3944_v50  ;;  %v1896_v7 = vpop.f32.mrf.mxu0 }
 0x114   :  { %2114 = vmatpush.bf16.msra.mxu1 %v3392_v58  ;;  %v1858_v8 = vadd.f32 %v1857_v32, %v1845_v5  ;;  %v1870_v14 = vpop.f32.mrf.mxu1 }
 0x115   :  { %2485 = vmatpush.bf16.msra.mxu2 %v3954_v42  ;;  %v1871_v24 = vadd.f32 %v1870_v14, %v393_v19 }
 0x116   :  { %2102 = vmatpush.bf16.msrb.mxu3 %v3212_v54  ;;  %v2135_v9 = vmax.f32 %v1858_v8, 0.0  ;;  %v3980_v8 = vld [vmem:[#allocation8 + $0x128] sm:$0xff] }
 0x117   :  { %2475 = vmatpush.bf16.msra.mxu0 %v3943_v18  ;;  %v1859_v53 = vpop.f32.mrf.mxu2 }
 0x118   :  { %2115 = vmatpush.bf16.msra.mxu1 %v3372_v62  ;;  %v2140_v13 = vpack.c.bf16 %v2135_v9, %v2135_v9  ;;  %v3977_v53 = vld [vmem:[#allocation8 + $0x110] sm:$0xff] }
 0x119   :  { %2486 = vmatpush.bf16.msra.mxu2 %v3953_v56  ;;  %2103 = vmatmul.bf16.vlgmr.msrb.gmra.mxu3 %v4188_v30  ;;  %v3962_v30 = vld [vmem:[#allocation8 + $0x98] sm:$0xff] }
 0x11a   :  { %2494 = vmatpush.bf16.msra.mxu3 %v3966_v59  ;;  %2476 = vmatmul.bf16.vlgmr.msra.gmra.mxu0 %v2139_v60  ;;  %v3981_v60 = vld [vmem:[#allocation8 + $0x130] sm:$0xff] }
 0x11b   :  { %2116 = vmatmul.bf16.vlgmr.msra.gmra.mxu1 %v4190_v35  ;;  %v3961_v35 = vld [vmem:[#allocation8 + $0x90] sm:$0xff]  ;;  %v1898_v16 = vpop.f32.mrf.mxu0  ;;  %2520 = vmatpush.bf16.msrb.mxu0 %v3982_v0 }
 0x11c   :  { %v1883_v15 = vpop.f32.mrf.mxu3  ;;  %v1872_v3 = vpop.f32.mrf.mxu1  ;;  %2507 = vmatpush.bf16.msrb.mxu1 %v3974_v20  ;;  %v3976_v16 = vld [vmem:[#allocation8 + $0x108] sm:$0xff] }
 0x11d   :  { %2487 = vmatpush.bf16.msra.mxu2 %v3952_v55  ;;  %v1884_v26 = vadd.f32 %v1883_v15, %v1871_v24 }
 0x11e   :  { %2495 = vmatpush.bf16.msra.mxu3 %v3965_v2 }
 0x11f   :  { %v1897_v28 = vadd.f32 %v1896_v7, %v1884_v26  ;;  %2521 = vmatpush.bf16.msrb.mxu0 %v3981_v60  ;;  %v3979_v7 = vld [vmem:[#allocation8 + $0x120] sm:$0xff] }
 0x120   :  { %2508 = vmatpush.bf16.msrb.mxu1 %v3973_v22  ;;  %v395_v22 = vperm.slane %v4236_v63, 4 }
 0x121   :  { %2488 = vmatpush.bf16.msra.mxu2 %v3951_v4 }
 0x122   :  { %2496 = vmatpush.bf16.msra.mxu3 %v3964_v6 }
 0x123   :  { %v1909_v40 = vpop.f32.mrf.mxu2  ;;  %v1948_v25 = vpop.f32.mrf.mxu0  ;;  %2522 = vmatpush.bf16.msrb.mxu0 %v3980_v8 }
 0x124   :  { %2489 = vmatmul.bf16.vlgmr.msra.gmra.mxu2 %v2140_v13  ;;  %v1885_v21 = vpop.f32.mrf.mxu3  ;;  %2509 = vmatpush.bf16.msrb.mxu1 %v3972_v31  ;;  %v1910_v33 = vadd.f32 %v1909_v40, %v1897_v28 }
 0x126   :  { %2497 = vmatpush.bf16.msra.mxu3 %v3963_v11 }
 0x127   :  { %2523 = vmatpush.bf16.msrb.mxu0 %v3979_v7 }
 0x128   :  { %2510 = vmatpush.bf16.msrb.mxu1 %v3971_v44 }
 0x12a   :  { %2498 = vmatpush.bf16.msra.mxu3 %v3962_v30  ;;  %v3978_v30 = vld [vmem:[#allocation8 + $0x118] sm:$0xff] }
 0x12b   :  { %v1911_v27 = vpop.f32.mrf.mxu2  ;;  %v1950_v29 = vpop.f32.mrf.mxu0  ;;  %2524 = vmatpush.bf16.msrb.mxu0 %v3978_v30 }
 0x12c   :  { %2511 = vmatpush.bf16.msrb.mxu1 %v3970_v37 }
 0x12e   :  { %2499 = vmatpush.bf16.msra.mxu3 %v3961_v35 }
 0x12f   :  { %2525 = vmatpush.bf16.msrb.mxu0 %v3977_v53 }
 0x130   :  { %2512 = vmatpush.bf16.msrb.mxu1 %v3969_v39 }
 0x132   :  { %2500 = vmatpush.bf16.msra.mxu3 %v3960_v17  ;;  %v3975_v17 = vld [vmem:[#allocation8 + $0x100] sm:$0xff] }
 0x133   :  { %2526 = vmatpush.bf16.msrb.mxu0 %v3976_v16 }
 0x134   :  { %v1922_v34 = vpop.f32.mrf.mxu1  ;;  %2513 = vmatpush.bf16.msrb.mxu1 %v3968_v48 }
 0x135   :  { %v1923_v43 = vadd.f32 %v1922_v34, %v1910_v33 }
 0x136   :  { %2501 = vmatpush.bf16.msra.mxu3 %v3959_v23 }
 0x137   :  { %v1974_v36 = vpop.f32.mrf.mxu0  ;;  %2527 = vmatpush.bf16.msrb.mxu0 %v3975_v17 }
 0x138   :  { %2514 = vmatpush.bf16.msrb.mxu1 %v3967_v51 }
 0x13c   :  { %v1935_v38 = vpop.f32.mrf.mxu3  ;;  %v1924_v42 = vpop.f32.mrf.mxu1 }
 0x13d   :  { %v1936_v10 = vadd.f32 %v1935_v38, %v1923_v43 }
 0x13f   :  { %v1949_v41 = vadd.f32 %v1948_v25, %v1936_v10  ;;  %v1976_v47 = vpop.f32.mrf.mxu0  ;;  %v3992_v10 = vld [vmem:[%s4270_s4] ss:$0 sm:$0xff] }
 0x141   :  { %v2136_v46 = vmax.f32 %v1949_v41, 0.0 }
 0x143   :  { %v2141_v49 = vpack.c.bf16 %v2136_v46, %v2136_v46  ;;  %v1961_v58 = vpop.f32.mrf.mxu2 }
 0x144   :  { %v1937_v50 = vpop.f32.mrf.mxu3  ;;  %v1962_v54 = vadd.f32 %v1961_v58, %v394_v52 }
 0x145   :  { %2502 = vmatmul.bf16.vlgmr.msra.gmra.mxu3 %v2141_v49 }
 0x146   :  { %v1975_v57 = vadd.f32 %v1974_v36, %v1962_v54 }
 0x14b   :  { %v1963_v12 = vpop.f32.mrf.mxu2 }
 0x154   :  { %v1987_v56 = vpop.f32.mrf.mxu1 }
 0x155   :  { %v1988_v61 = vadd.f32 %v1987_v56, %v1975_v57 }
 0x157   :  { %v2026_v59 = vpop.f32.mrf.mxu0 }
 0x15c   :  { %v1989_v62 = vpop.f32.mrf.mxu1  ;;  %v2000_v18 = vpop.f32.mrf.mxu3 }
 0x15d   :  { %v2001_v1 = vadd.f32 %v2000_v18, %v1988_v61 }
 0x15f   :  { %v2028_v45 = vpop.f32.mrf.mxu0 }
 0x163   :  { %v2013_v55 = vpop.f32.mrf.mxu2 }
 0x164   :  { %v2014_v2 = vadd.f32 %v2013_v55, %v2001_v1  ;;  %v2039_v5 = vpop.f32.mrf.mxu1  ;;  %v2002_v6 = vpop.f32.mrf.mxu3 }
 0x166   :  { %v2027_v4 = vadd.f32 %v2026_v59, %v2014_v2 }
 0x168   :  { %v2040_v32 = vadd.f32 %v2039_v5, %v2027_v4 }
 0x16a   :  { %v2137_v9 = vmax.f32 %v2040_v32, 0.0 }
 0x16b   :  { %v2015_v11 = vpop.f32.mrf.mxu2 }
 0x16c   :  { %v2142_v13 = vpack.c.bf16 %v2137_v9, %v2137_v9  ;;  %v2041_v14 = vpop.f32.mrf.mxu1 }
 0x16e   :  { %2515 = vmatmul.bf16.vlgmr.msrb.gmra.mxu1 %v2142_v13 }
 0x177   :  { %v2091_v35 = vpop.f32.mrf.mxu0 }
 0x178   :  { %v2065_v15 = vpop.f32.mrf.mxu1 }
 0x17c   :  { %v2052_v3 = vpop.f32.mrf.mxu3 }
 0x17d   :  { %v2053_v24 = vadd.f32 %v2052_v3, %v395_v22 }
 0x17f   :  { %v2093_v40 = vpop.f32.mrf.mxu0  ;;  %v2066_v25 = vadd.f32 %v2065_v15, %v2053_v24 }
 0x180   :  { %v2067_v20 = vpop.f32.mrf.mxu1 }
 0x183   :  { %v2078_v19 = vpop.f32.mrf.mxu2 }
 0x184   :  { %v2054_v21 = vpop.f32.mrf.mxu3  ;;  %v2079_v27 = vadd.f32 %v2078_v19, %v2066_v25 }
 0x186   :  { %v2092_v31 = vadd.f32 %v2091_v35, %v2079_v27 }
 0x18b   :  { %v2080_v23 = vpop.f32.mrf.mxu2 }
 0x193   :  { %v2130_v26 = vpop.f32.mrf.mxu2 }
 0x197   :  { %v2477_v29 = vpop.f32.mrf.mxu0 }
 0x198   :  { %v2117_v28 = vpop.f32.mrf.mxu1  ;;  %v2478_v42 = vadd.f32 %v3992_v10, %v2477_v29 }
 0x19b   :  { %v2132_v33 = vpop.f32.mrf.mxu2 }
 0x19c   :  { %v2104_v44 = vpop.f32.mrf.mxu3 }
 0x19d   :  { %v2105_v34 = vadd.f32 %v2104_v44, %v2092_v31 }
 0x19f   :  { %v2118_v43 = vadd.f32 %v2117_v28, %v2105_v34  ;;  %v2479_v37 = vpop.f32.mrf.mxu0 }
 0x1a0   :  { %v2119_v36 = vpop.f32.mrf.mxu1 }
 0x1a1   :  { %v2131_v38 = vadd.f32 %v2130_v26, %v2118_v43 }
 0x1a3   :  { %v2138_v63 = vmax.f32 %v2131_v38, 0.0 }
 0x1a4   :  { %v2106_v39 = vpop.f32.mrf.mxu3 }
 0x1a5   :  { %v2143_v41 = vpack.c.bf16 %v2138_v63, %v2138_v63 }
 0x1a7   :  { %2528 = vmatmul.bf16.vlgmr.msrb.gmra.mxu0 %v2143_v41  ;;  %v2490_v46 = vpop.f32.mrf.mxu2 }
 0x1a8   :  { %v2491_v47 = vadd.f32 %v2490_v46, %v2478_v42 }
 0x1af   :  { %v2492_v48 = vpop.f32.mrf.mxu2 }
 0x1c8   :  { %v2503_v49 = vpop.f32.mrf.mxu3 }
 0x1c9   :  { %v2504_v58 = vadd.f32 %v2503_v49, %v2491_v47 }
 0x1d0   :  { %v2505_v50 = vpop.f32.mrf.mxu3 }
 0x1eb   :  { %v2516_v51 = vpop.f32.mrf.mxu1 }
 0x1ec   :  { %v2517_v52 = vadd.f32 %v2516_v51, %v2504_v58 }
 0x1f3   :  { %v2518_v12 = vpop.f32.mrf.mxu1 }
 0x224   :  { %v2529_v54 = vpop.f32.mrf.mxu0 }
 0x225   :  { %v2530_v56 = vadd.f32 %v2529_v54, %v2517_v52 }
 0x227   :  { %2533 = vst [vmem:[#allocation10] sm:$0xff] %v2530_v56 }
 0x228   :  { %2544 = dma.vmem_to_hbm [thread:$0]  %s2540_s16, 128, %s2542_s19, [#allocation4]  }
 0x22c   :  { %v2531_v57 = vpop.f32.mrf.mxu0 }
 0x22d   :  { %4119 = dma.done.wait [#allocation4], 128  }
 0x22e   :  { %4120 = vsyncadd [#allocation4], 4294967168 }
 0x22f   :  { %2549 = vsyncpa [#allocation3], 1 }
 0x230   :  { %2550 = vsyncpa [#allocation6], 1 }
 0x231   :  { %2551 = vsyncpa [#allocation9], 1 }
 0x232   :  { %2552 = vsyncpa [#allocation4], 1 }

</bundles_post_ra>
